<compile_context>
chip_gen: v6e
topology: v6e:2x2x1
jax: 0.10.0
libtpu: 0.0.40
codegen_flags: <defaults>
</compile_context>

<pallas_src>
import jax
import jax.numpy as jnp
from jax import lax
from jax.experimental import pallas as pl
from jax.experimental.pallas import tpu as pltpu


def one_conv_kernel(xpad_ref, w_ref, b_ref, alpha_ref, o_ref):
    # xpad_ref : (1, H+2, W+2, G0)  spatially zero-padded input, native dtype
    # w_ref    : (9, G0, G)         3x3 taps, tap-major (t = dy*3 + dx)
    # b_ref    : (1, G)
    # alpha_ref: (1, 1) in SMEM     shared PReLU slope
    # o_ref    : (1, H*W, G0+G)     concat(x, PReLU(conv(x))), channels-last
    H = xpad_ref.shape[1] - 2
    W = xpad_ref.shape[2] - 2
    G0 = xpad_ref.shape[3]
    G = b_ref.shape[1]

    # f32 accumulator initialized with the (broadcast) bias.
    acc = jnp.broadcast_to(b_ref[...].astype(jnp.float32), (H * W, G))

    # 3x3 conv as nine shifted matmuls on the MXU, accumulated in f32.
    for dy in range(3):
        for dx in range(3):
            xs = xpad_ref[0, dy:dy + H, dx:dx + W, :].reshape(H * W, G0)
            if dy == 1 and dx == 1:
                # Center tap == the unpadded x: fused concat passthrough.
                # Store it now so the write overlaps the remaining taps.
                o_ref[0, :, 0:G0] = xs.astype(o_ref.dtype)
            acc = acc + jnp.dot(xs, w_ref[3 * dy + dx],
                                preferred_element_type=jnp.float32)

    # PReLU with a single shared alpha (scalar read from SMEM).
    alpha = alpha_ref[0, 0]
    act = jnp.where(acc >= 0, acc, alpha * acc)

    # Second half of the fused concat: [x | PReLU(conv(x))].
    o_ref[0, :, G0:G0 + G] = act.astype(o_ref.dtype)


def one_conv(x_nchw, w_oihw, b, alpha):
    """x_nchw: (N, G0, H, W); w_oihw: (G, G0, 3, 3); b: (G,); alpha: scalar."""
    N, G0, H, W = x_nchw.shape
    G = w_oihw.shape[0]

    # NCHW -> NHWC with a 1-pixel zero halo (one fused XLA copy).  If the
    # surrounding model already runs channels-last this transpose disappears.
    x_nhwc = jnp.transpose(x_nchw, (0, 2, 3, 1))
    xpad = jnp.pad(x_nhwc, ((0, 0), (1, 1), (1, 1), (0, 0)))

    # Conv weight (G, G0, 3, 3) -> tap-major matmul matrices (9, G0, G).
    w_taps = jnp.transpose(w_oihw, (2, 3, 1, 0)).reshape(9, G0, G)
    b2 = b.reshape(1, G)
    alpha2 = jnp.reshape(alpha, (1, 1)).astype(jnp.float32)

    out = pl.pallas_call(
        one_conv_kernel,
        out_shape=jax.ShapeDtypeStruct((N, H * W, G0 + G), x_nchw.dtype),
        grid_spec=pltpu.PrefetchScalarGridSpec(
            num_scalar_prefetch=0,
            grid=(N,),
            in_specs=[
                pl.BlockSpec((1, H + 2, W + 2, G0), lambda n: (n, 0, 0, 0)),
                pl.BlockSpec((9, G0, G), lambda n: (0, 0, 0)),
                pl.BlockSpec((1, G), lambda n: (0, 0)),
                pl.BlockSpec(memory_space=pltpu.MemorySpace.SMEM),
            ],
            out_specs=pl.BlockSpec((1, H * W, G0 + G), lambda n: (n, 0, 0)),
        ),
        compiler_params=pltpu.CompilerParams(
            dimension_semantics=("parallel",),
            vmem_limit_bytes=32 * 1024 * 1024,
        ),
    )(xpad, w_taps, b2, alpha2)

    # (N, H*W, G0+G) -> (N, G0+G, H, W)
    return jnp.transpose(out.reshape(N, H, W, G0 + G), (0, 3, 1, 2))


def reference_one_conv(x_nchw, w_oihw, b, alpha):
    # Pure-JAX reference mirroring the PyTorch module.
    y = lax.conv_general_dilated(
        x_nchw, w_oihw, window_strides=(1, 1), padding=((1, 1), (1, 1)),
        dimension_numbers=("NCHW", "OIHW", "NCHW"))
    y = y + b[None, :, None, None]
    y = jnp.where(y >= 0, y, alpha * y)                    # PReLU, shared alpha
    return jnp.concatenate([x_nchw, y], axis=1)


if __name__ == "__main__":
    N, G0, G, H, W = 2, 4, 8, 16, 16

    key = jax.random.PRNGKey(0)
    kx, kw, kb = jax.random.split(key, 3)

    x = jax.random.normal(kx, (N, G0, H, W), dtype=jnp.float32)
    w = jax.random.normal(kw, (G, G0, 3, 3), dtype=jnp.float32) * 0.1
    b = jax.random.normal(kb, (G,), dtype=jnp.float32) * 0.1
    alpha = jnp.float32(0.25)                              # nn.PReLU() default

    out = one_conv(x, w, b, alpha)
    out = jax.block_until_ready(out)

    ref = reference_one_conv(x, w, b, alpha)
    assert out.shape == (N, G0 + G, H, W) and out.dtype == x.dtype
    assert jnp.allclose(out, ref, atol=1e-5, rtol=1e-5), "mismatch vs reference"

    print("KERNEL_OK")
</pallas_src>

<mosaic_0001>
module attributes {stable_mosaic.version = 11 : i64} {
  func.func @one_conv_kernel(%arg0: i32, %arg1: memref<1x18x18x4xf32, #tpu.memory_space<vmem>>, %arg2: memref<9x4x8xf32, #tpu.memory_space<vmem>>, %arg3: memref<1x8xf32, #tpu.memory_space<vmem>>, %arg4: memref<1x1xf32, #tpu.memory_space<smem>>, %arg5: memref<1x256x12xf32, #tpu.memory_space<vmem>>) attributes {dimension_semantics = [#tpu.dimension_semantics<parallel>], iteration_bounds = array<i64: 2>, scalar_prefetch = 0 : i64, scratch_operands = 0 : i64, tpu.core_type = #tpu.core_type<tc>, window_params = [{transform_indices = @transform_0, window_bounds = array<i64: 1, 18, 18, 4>}, {pipeline_mode = #tpu.pipeline_mode<synchronous>, transform_indices = @transform_1, window_bounds = array<i64: 9, 4, 8>}, {pipeline_mode = #tpu.pipeline_mode<synchronous>, transform_indices = @transform_2, window_bounds = array<i64: 1, 8>}, {transform_indices = @transform_3, window_bounds = array<i64: 1, 1>}, {transform_indices = @transform_4, window_bounds = array<i64: 1, 256, 12>}]} {
    %c0 = arith.constant 0 : index
    %c0_0 = arith.constant 0 : index
    %0 = vector.load %arg3[%c0, %c0_0] : memref<1x8xf32, #tpu.memory_space<vmem>>, vector<1x8xf32>
    %1 = vector.shape_cast %0 : vector<1x8xf32> to vector<1x8xf32>
    %2 = vector.broadcast %1 : vector<1x8xf32> to vector<256x8xf32>
    %c0_1 = arith.constant 0 : index
    %c0_2 = arith.constant 0 : index
    %c0_3 = arith.constant 0 : index
    %c0_4 = arith.constant 0 : index
    %3 = vector.load %arg1[%c0_1, %c0_2, %c0_3, %c0_4] : memref<1x18x18x4xf32, #tpu.memory_space<vmem>>, vector<1x16x16x4xf32>
    %4 = vector.shape_cast %3 : vector<1x16x16x4xf32> to vector<16x16x4xf32>
    %5 = vector.shape_cast %4 : vector<16x16x4xf32> to vector<256x4xf32>
    %c0_5 = arith.constant 0 : index
    %c0_6 = arith.constant 0 : index
    %c0_7 = arith.constant 0 : index
    %6 = vector.load %arg2[%c0_5, %c0_6, %c0_7] : memref<9x4x8xf32, #tpu.memory_space<vmem>>, vector<1x4x8xf32>
    %7 = vector.shape_cast %6 : vector<1x4x8xf32> to vector<4x8xf32>
    %cst = arith.constant dense<0.000000e+00> : vector<256x8xf32>
    %8 = tpu.matmul %5, %7, %cst {dimension_numbers = #tpu.dot_dimension_numbers<[1], [0], [0], [1], [0, 0, 1, 1], [], []>} : vector<256x4xf32>, vector<4x8xf32>, vector<256x8xf32> -> vector<256x8xf32>
    %9 = arith.addf %2, %8 : vector<256x8xf32>
    %c0_8 = arith.constant 0 : index
    %c0_9 = arith.constant 0 : index
    %c1 = arith.constant 1 : index
    %c0_10 = arith.constant 0 : index
    %10 = vector.load %arg1[%c0_8, %c0_9, %c1, %c0_10] : memref<1x18x18x4xf32, #tpu.memory_space<vmem>>, vector<1x16x16x4xf32>
    %11 = vector.shape_cast %10 : vector<1x16x16x4xf32> to vector<16x16x4xf32>
    %12 = vector.shape_cast %11 : vector<16x16x4xf32> to vector<256x4xf32>
    %c1_11 = arith.constant 1 : index
    %c0_12 = arith.constant 0 : index
    %c0_13 = arith.constant 0 : index
    %13 = vector.load %arg2[%c1_11, %c0_12, %c0_13] : memref<9x4x8xf32, #tpu.memory_space<vmem>>, vector<1x4x8xf32>
    %14 = vector.shape_cast %13 : vector<1x4x8xf32> to vector<4x8xf32>
    %cst_14 = arith.constant dense<0.000000e+00> : vector<256x8xf32>
    %15 = tpu.matmul %12, %14, %cst_14 {dimension_numbers = #tpu.dot_dimension_numbers<[1], [0], [0], [1], [0, 0, 1, 1], [], []>} : vector<256x4xf32>, vector<4x8xf32>, vector<256x8xf32> -> vector<256x8xf32>
    %16 = arith.addf %9, %15 : vector<256x8xf32>
    %c0_15 = arith.constant 0 : index
    %c0_16 = arith.constant 0 : index
    %c2 = arith.constant 2 : index
    %c0_17 = arith.constant 0 : index
    %17 = vector.load %arg1[%c0_15, %c0_16, %c2, %c0_17] : memref<1x18x18x4xf32, #tpu.memory_space<vmem>>, vector<1x16x16x4xf32>
    %18 = vector.shape_cast %17 : vector<1x16x16x4xf32> to vector<16x16x4xf32>
    %19 = vector.shape_cast %18 : vector<16x16x4xf32> to vector<256x4xf32>
    %c2_18 = arith.constant 2 : index
    %c0_19 = arith.constant 0 : index
    %c0_20 = arith.constant 0 : index
    %20 = vector.load %arg2[%c2_18, %c0_19, %c0_20] : memref<9x4x8xf32, #tpu.memory_space<vmem>>, vector<1x4x8xf32>
    %21 = vector.shape_cast %20 : vector<1x4x8xf32> to vector<4x8xf32>
    %cst_21 = arith.constant dense<0.000000e+00> : vector<256x8xf32>
    %22 = tpu.matmul %19, %21, %cst_21 {dimension_numbers = #tpu.dot_dimension_numbers<[1], [0], [0], [1], [0, 0, 1, 1], [], []>} : vector<256x4xf32>, vector<4x8xf32>, vector<256x8xf32> -> vector<256x8xf32>
    %23 = arith.addf %16, %22 : vector<256x8xf32>
    %c0_22 = arith.constant 0 : index
    %c1_23 = arith.constant 1 : index
    %c0_24 = arith.constant 0 : index
    %c0_25 = arith.constant 0 : index
    %24 = vector.load %arg1[%c0_22, %c1_23, %c0_24, %c0_25] : memref<1x18x18x4xf32, #tpu.memory_space<vmem>>, vector<1x16x16x4xf32>
    %25 = vector.shape_cast %24 : vector<1x16x16x4xf32> to vector<16x16x4xf32>
    %26 = vector.shape_cast %25 : vector<16x16x4xf32> to vector<256x4xf32>
    %c3 = arith.constant 3 : index
    %c0_26 = arith.constant 0 : index
    %c0_27 = arith.constant 0 : index
    %27 = vector.load %arg2[%c3, %c0_26, %c0_27] : memref<9x4x8xf32, #tpu.memory_space<vmem>>, vector<1x4x8xf32>
    %28 = vector.shape_cast %27 : vector<1x4x8xf32> to vector<4x8xf32>
    %cst_28 = arith.constant dense<0.000000e+00> : vector<256x8xf32>
    %29 = tpu.matmul %26, %28, %cst_28 {dimension_numbers = #tpu.dot_dimension_numbers<[1], [0], [0], [1], [0, 0, 1, 1], [], []>} : vector<256x4xf32>, vector<4x8xf32>, vector<256x8xf32> -> vector<256x8xf32>
    %30 = arith.addf %23, %29 : vector<256x8xf32>
    %c0_29 = arith.constant 0 : index
    %c1_30 = arith.constant 1 : index
    %c1_31 = arith.constant 1 : index
    %c0_32 = arith.constant 0 : index
    %31 = vector.load %arg1[%c0_29, %c1_30, %c1_31, %c0_32] : memref<1x18x18x4xf32, #tpu.memory_space<vmem>>, vector<1x16x16x4xf32>
    %32 = vector.shape_cast %31 : vector<1x16x16x4xf32> to vector<16x16x4xf32>
    %33 = vector.shape_cast %32 : vector<16x16x4xf32> to vector<256x4xf32>
    %c0_33 = arith.constant 0 : index
    %c0_34 = arith.constant 0 : index
    %c0_35 = arith.constant 0 : index
    %34 = vector.load %arg5[%c0_33, %c0_34, %c0_35] : memref<1x256x12xf32, #tpu.memory_space<vmem>>, vector<1x256x4xf32>
    %35 = vector.shape_cast %34 : vector<1x256x4xf32> to vector<256x4xf32>
    %36 = vector.shape_cast %33 : vector<256x4xf32> to vector<1x256x4xf32>
    tpu.vector_store %arg5[%c0_33, %c0_34, %c0_35], %36 {strides = array<i32>} : memref<1x256x12xf32, #tpu.memory_space<vmem>>, vector<1x256x4xf32>,
    %c4 = arith.constant 4 : index
    %c0_36 = arith.constant 0 : index
    %c0_37 = arith.constant 0 : index
    %37 = vector.load %arg2[%c4, %c0_36, %c0_37] : memref<9x4x8xf32, #tpu.memory_space<vmem>>, vector<1x4x8xf32>
    %38 = vector.shape_cast %37 : vector<1x4x8xf32> to vector<4x8xf32>
    %cst_38 = arith.constant dense<0.000000e+00> : vector<256x8xf32>
    %39 = tpu.matmul %33, %38, %cst_38 {dimension_numbers = #tpu.dot_dimension_numbers<[1], [0], [0], [1], [0, 0, 1, 1], [], []>} : vector<256x4xf32>, vector<4x8xf32>, vector<256x8xf32> -> vector<256x8xf32>
    %40 = arith.addf %30, %39 : vector<256x8xf32>
    %c0_39 = arith.constant 0 : index
    %c1_40 = arith.constant 1 : index
    %c2_41 = arith.constant 2 : index
    %c0_42 = arith.constant 0 : index
    %41 = vector.load %arg1[%c0_39, %c1_40, %c2_41, %c0_42] : memref<1x18x18x4xf32, #tpu.memory_space<vmem>>, vector<1x16x16x4xf32>
    %42 = vector.shape_cast %41 : vector<1x16x16x4xf32> to vector<16x16x4xf32>
    %43 = vector.shape_cast %42 : vector<16x16x4xf32> to vector<256x4xf32>
    %c5 = arith.constant 5 : index
    %c0_43 = arith.constant 0 : index
    %c0_44 = arith.constant 0 : index
    %44 = vector.load %arg2[%c5, %c0_43, %c0_44] : memref<9x4x8xf32, #tpu.memory_space<vmem>>, vector<1x4x8xf32>
    %45 = vector.shape_cast %44 : vector<1x4x8xf32> to vector<4x8xf32>
    %cst_45 = arith.constant dense<0.000000e+00> : vector<256x8xf32>
    %46 = tpu.matmul %43, %45, %cst_45 {dimension_numbers = #tpu.dot_dimension_numbers<[1], [0], [0], [1], [0, 0, 1, 1], [], []>} : vector<256x4xf32>, vector<4x8xf32>, vector<256x8xf32> -> vector<256x8xf32>
    %47 = arith.addf %40, %46 : vector<256x8xf32>
    %c0_46 = arith.constant 0 : index
    %c2_47 = arith.constant 2 : index
    %c0_48 = arith.constant 0 : index
    %c0_49 = arith.constant 0 : index
    %48 = vector.load %arg1[%c0_46, %c2_47, %c0_48, %c0_49] : memref<1x18x18x4xf32, #tpu.memory_space<vmem>>, vector<1x16x16x4xf32>
    %49 = vector.shape_cast %48 : vector<1x16x16x4xf32> to vector<16x16x4xf32>
    %50 = vector.shape_cast %49 : vector<16x16x4xf32> to vector<256x4xf32>
    %c6 = arith.constant 6 : index
    %c0_50 = arith.constant 0 : index
    %c0_51 = arith.constant 0 : index
    %51 = vector.load %arg2[%c6, %c0_50, %c0_51] : memref<9x4x8xf32, #tpu.memory_space<vmem>>, vector<1x4x8xf32>
    %52 = vector.shape_cast %51 : vector<1x4x8xf32> to vector<4x8xf32>
    %cst_52 = arith.constant dense<0.000000e+00> : vector<256x8xf32>
    %53 = tpu.matmul %50, %52, %cst_52 {dimension_numbers = #tpu.dot_dimension_numbers<[1], [0], [0], [1], [0, 0, 1, 1], [], []>} : vector<256x4xf32>, vector<4x8xf32>, vector<256x8xf32> -> vector<256x8xf32>
    %54 = arith.addf %47, %53 : vector<256x8xf32>
    %c0_53 = arith.constant 0 : index
    %c2_54 = arith.constant 2 : index
    %c1_55 = arith.constant 1 : index
    %c0_56 = arith.constant 0 : index
    %55 = vector.load %arg1[%c0_53, %c2_54, %c1_55, %c0_56] : memref<1x18x18x4xf32, #tpu.memory_space<vmem>>, vector<1x16x16x4xf32>
    %56 = vector.shape_cast %55 : vector<1x16x16x4xf32> to vector<16x16x4xf32>
    %57 = vector.shape_cast %56 : vector<16x16x4xf32> to vector<256x4xf32>
    %c7 = arith.constant 7 : index
    %c0_57 = arith.constant 0 : index
    %c0_58 = arith.constant 0 : index
    %58 = vector.load %arg2[%c7, %c0_57, %c0_58] : memref<9x4x8xf32, #tpu.memory_space<vmem>>, vector<1x4x8xf32>
    %59 = vector.shape_cast %58 : vector<1x4x8xf32> to vector<4x8xf32>
    %cst_59 = arith.constant dense<0.000000e+00> : vector<256x8xf32>
    %60 = tpu.matmul %57, %59, %cst_59 {dimension_numbers = #tpu.dot_dimension_numbers<[1], [0], [0], [1], [0, 0, 1, 1], [], []>} : vector<256x4xf32>, vector<4x8xf32>, vector<256x8xf32> -> vector<256x8xf32>
    %61 = arith.addf %54, %60 : vector<256x8xf32>
    %c0_60 = arith.constant 0 : index
    %c2_61 = arith.constant 2 : index
    %c2_62 = arith.constant 2 : index
    %c0_63 = arith.constant 0 : index
    %62 = vector.load %arg1[%c0_60, %c2_61, %c2_62, %c0_63] : memref<1x18x18x4xf32, #tpu.memory_space<vmem>>, vector<1x16x16x4xf32>
    %63 = vector.shape_cast %62 : vector<1x16x16x4xf32> to vector<16x16x4xf32>
    %64 = vector.shape_cast %63 : vector<16x16x4xf32> to vector<256x4xf32>
    %c8 = arith.constant 8 : index
    %c0_64 = arith.constant 0 : index
    %c0_65 = arith.constant 0 : index
    %65 = vector.load %arg2[%c8, %c0_64, %c0_65] : memref<9x4x8xf32, #tpu.memory_space<vmem>>, vector<1x4x8xf32>
    %66 = vector.shape_cast %65 : vector<1x4x8xf32> to vector<4x8xf32>
    %cst_66 = arith.constant dense<0.000000e+00> : vector<256x8xf32>
    %67 = tpu.matmul %64, %66, %cst_66 {dimension_numbers = #tpu.dot_dimension_numbers<[1], [0], [0], [1], [0, 0, 1, 1], [], []>} : vector<256x4xf32>, vector<4x8xf32>, vector<256x8xf32> -> vector<256x8xf32>
    %68 = arith.addf %61, %67 : vector<256x8xf32>
    %c0_67 = arith.constant 0 : index
    %c0_68 = arith.constant 0 : index
    %69 = memref.load %arg4[%c0_67, %c0_68] : memref<1x1xf32, #tpu.memory_space<smem>>
    %cst_69 = arith.constant 0.000000e+00 : f32
    %70 = vector.broadcast %cst_69 : f32 to vector<256x8xf32>
    %71 = arith.cmpf oge, %68, %70 : vector<256x8xf32>
    %72 = vector.broadcast %69 : f32 to vector<256x8xf32>
    %73 = arith.mulf %72, %68 : vector<256x8xf32>
    %74 = arith.select %71, %68, %73 : vector<256x8xi1>, vector<256x8xf32>
    %c0_70 = arith.constant 0 : index
    %c0_71 = arith.constant 0 : index
    %c4_72 = arith.constant 4 : index
    %75 = vector.load %arg5[%c0_70, %c0_71, %c4_72] : memref<1x256x12xf32, #tpu.memory_space<vmem>>, vector<1x256x8xf32>
    %76 = vector.shape_cast %75 : vector<1x256x8xf32> to vector<256x8xf32>
    %77 = vector.shape_cast %74 : vector<256x8xf32> to vector<1x256x8xf32>
    tpu.vector_store %arg5[%c0_70, %c0_71, %c4_72], %77 {strides = array<i32>} : memref<1x256x12xf32, #tpu.memory_space<vmem>>, vector<1x256x8xf32>,
    return
  }
  func.func @transform_0(%arg0: i32) -> (i32, i32, i32, i32) {
    %c0_i32 = arith.constant 0 : i32
    %c0_i32_0 = arith.constant 0 : i32
    %c0_i32_1 = arith.constant 0 : i32
    %c0_i32_2 = arith.constant 0 : i32
    return %arg0, %c0_i32, %c0_i32_0, %c0_i32_1 : i32, i32, i32, i32
  }
  func.func @transform_1(%arg0: i32) -> (i32, i32, i32) {
    %c0_i32 = arith.constant 0 : i32
    %c0_i32_0 = arith.constant 0 : i32
    %c0_i32_1 = arith.constant 0 : i32
    %c0_i32_2 = arith.constant 0 : i32
    return %c0_i32, %c0_i32_0, %c0_i32_1 : i32, i32, i32
  }
  func.func @transform_2(%arg0: i32) -> (i32, i32) {
    %c0_i32 = arith.constant 0 : i32
    %c0_i32_0 = arith.constant 0 : i32
    %c0_i32_1 = arith.constant 0 : i32
    return %c0_i32, %c0_i32_0 : i32, i32
  }
  func.func @transform_3(%arg0: i32) -> (i32, i32) {
    %c0_i32 = arith.constant 0 : i32
    %c0_i32_0 = arith.constant 0 : i32
    %c0_i32_1 = arith.constant 0 : i32
    return %c0_i32, %c0_i32_0 : i32, i32
  }
  func.func @transform_4(%arg0: i32) -> (i32, i32, i32) {
    %c0_i32 = arith.constant 0 : i32
    %c0_i32_0 = arith.constant 0 : i32
    %c0_i32_1 = arith.constant 0 : i32
    return %arg0, %c0_i32, %c0_i32_0 : i32, i32, i32
  }
}

</mosaic_0001>

<bundles_post_ra>
// kernel: tpu_custom_call.1
= control target key start
LH: loop header
LB: loop body
LE: loop exit
PB: predicated region body
PF: predicated region fallthrough
CT: control target
= control target key end

     0   :  { %s5370_s17 = smov 0   ;;  %s7031_s0 = inlined_call_operand.vmem [shape: f32[2,18,18,4], index: 0, kind: input, shape index: {}]   ;;  %s7032_s1 = inlined_call_operand.vmem [shape: f32[9,4,8], index: 1, kind: input, shape index: {}]   ;;  %s7033_s2 = inlined_call_operand.vmem [shape: f32[1,8], index: 2, kind: input, shape index: {}]   ;;  %s7034_s3 = inlined_call_operand.<no memory space> [shape: f32[1,1], index: 3, kind: input, shape index: {}]   ;;  %s7035_s4 = inlined_call_operand.vmem [shape: f32[2,256,12], index: 4, kind: output, shape index: {}]  }
   0x1   :  { %9 = sst [smem:[#allocation2]] %s7034_s3 }
   0x2 LB: > { %s4065_s18 = sadd.s32 4294967295, %s5339_s17   ;;  %p4069_p0 = scmp.ge.s32.totalorder %s5339_s17, 1  ;;  %s5339_s17 = sphi %s5370_s17, %s15_s17  }
   0x3   : > { %p163_p1 = scmp.lt.s32.totalorder %s5339_s17, 3 }
   0x5   : > { %p164_p2 = pnand %p4069_p0, %p163_p1 }
   0x7   : > { %167 = sbr.rel (%p164_p2) target bundleno = 625 (0x271), region = 36 }
   0xc   : > { %v238_v0 = vld [vmem:[%s7032_s1] sm:$0xf]  ;;  %vm336_vm0 = vcmask 1043456   ;;  %p189_p3 = scmp.lt.s32.totalorder %s4065_s18, 1  ;;  %v4107_v1 = vld [vmem:[%s7032_s1 + $0x4] sm:$0xf] }
   0xd   : > { %5321 = vmatprep.subr.msk.mxu1 %vm336_vm0, %v238_v0  ;;  %4871 = vmatprep.subr.msk.mxu0 %vm336_vm0, %v238_v0  ;;  %v4141_v2 = vld [vmem:[%s7032_s1 + $0x8] sm:$0xf]  ;;  %vm239_vm1 = vcmask 31744   ;;  %v5424_v9 = vld [vmem:[%s7032_s1 + $0xc] sm:$0xf]  ;;  %s3751_s3 = sld [smem:[#allocation2]] }
   0xe   : > { %5322 = vmatpush3.msk.msra.mxu1 %vm336_vm0, %v238_v0  ;;  %4872 = vmatpush3.msk.msra.mxu0 %vm336_vm0, %v238_v0  ;;  %s7178_s18 = smov (!%p189_p3, %s4065_s18), 1  ;;  %v5429_v10 = vld [vmem:[%s7032_s1 + $0x10] sm:$0xf]  ;;  %s5341_s21 = smov 4  }
   0xf   : > { %4921 = vmatprep.subr.msk.mxu1 %vm336_vm0, %v4107_v1  ;;  %4971 = vmatprep.subr.msk.mxu0 %vm336_vm0, %v4141_v2  ;;  %s5323_s24 = smul.u32 432, %s7178_s18  ;;  %s4573_s6 = sshll.u32 %s7178_s18, 8 }
  0x10   : > { %s5481_s9 = scalar_lea.vmem %s7035_s4, %s4573_s6 }
  0x11   : > { %s5399_s27 = scalar_lea.vmem %s7031_s0, %s5323_s24 }
  0x12   : > { %v206_v3 = vld [vmem:[%s5399_s27] sm:$0xff]  ;;  %v207_v5 = vld [vmem:[%s5399_s27 + $0x8] sm:$0xff]  ;;  %v5413_v7 = vld [vmem:[%s5399_s27 + $0x18] sm:$0xff] }
  0x13   : > { %v5403_v4 = vld [vmem:[%s5399_s27 + $0xc0] sm:$0xff]  ;;  %4873 = vmatprep.mubr.msk.f32.mxu0 %vm239_vm1, %v206_v3  ;;  %v5410_v6 = vld [vmem:[%s5399_s27 + $0xc8] sm:$0xff]  ;;  %v5416_v8 = vld [vmem:[%s5399_s27 + $0xd8] sm:$0xff] }
  0x14   : > { %4897 = vmatprep.mubr.msk.f32.mxu1 %vm239_vm1, %v5403_v4  ;;  %4874 = vmatmul.mubr.msk.f32.vlgmr.msra.gmra.mxu0 %vm239_vm1, %v207_v5  ;;  %v5434_v11 = vld [vmem:[%s5399_s27 + $0x20] sm:$0xff]  ;;  %v5444_v13 = vld [vmem:[%s5399_s27 + $0x30] sm:$0xff]  ;;  %v5462_v15 = vld [vmem:[%s5399_s27 + $0x38] sm:$0xff] }
  0x15   : > { %4898 = vmatmul.mubr.msk.f32.vlgmr.msra.gmra.mxu1 %vm239_vm1, %v5410_v6  ;;  %4972 = vmatpush3.msk.msra.mxu0 %vm336_vm0, %v4141_v2  ;;  %v5437_v12 = vld [vmem:[%s5399_s27 + $0xe0] sm:$0xff]  ;;  %v5447_v14 = vld [vmem:[%s5399_s27 + $0xf0] sm:$0xff]  ;;  %v5465_v16 = vld [vmem:[%s5399_s27 + $0xf8] sm:$0xff] }
  0x16   : > { %4922 = vmatpush3.msk.msra.mxu1 %vm336_vm0, %v4107_v1  ;;  %4876 = vmatprep.mubr.msk.f32.mxu0 %vm239_vm1, %v5413_v7  ;;  %v5469_v17 = vld [vmem:[%s5399_s27 + $0x48] sm:$0xff]  ;;  %v5488_v19 = vld [vmem:[%s5399_s27 + $0x50] sm:$0xff]  ;;  %v5494_v21 = vld [vmem:[%s5399_s27 + $0x60] sm:$0xff] }
  0x17   : > { %4900 = vmatprep.mubr.msk.f32.mxu1 %vm239_vm1, %v5416_v8  ;;  %5021 = vmatprep.subr.msk.mxu1 %vm336_vm0, %v5424_v9  ;;  %v5472_v18 = vld [vmem:[%s5399_s27 + $0x108] sm:$0xff]  ;;  %v5491_v20 = vld [vmem:[%s5399_s27 + $0x110] sm:$0xff]  ;;  %v5497_v22 = vld [vmem:[%s5399_s27 + $0x120] sm:$0xff] }
  0x18   : > { %5071 = vmatprep.subr.msk.mxu0 %vm336_vm0, %v5429_v10  ;;  %4877 = vmatmul.mubr.msk.f32.gmra.mxu0 %vm239_vm1, %v5434_v11  ;;  %v5500_v23 = vld [vmem:[%s5399_s27 + $0x19] sm:$0xff]  ;;  %v5503_v24 = vld [vmem:[%s5399_s27 + $0x21] sm:$0xff]  ;;  %v5506_v25 = vld [vmem:[%s5399_s27 + $0x31] sm:$0xff] }
  0x19   : > { %4901 = vmatmul.mubr.msk.f32.gmra.mxu1 %vm239_vm1, %v5437_v12  ;;  %4879 = vmatprep.mubr.msk.f32.mxu0 %vm239_vm1, %v5444_v13  ;;  %1800 = vst.msk [vmem:[%s5481_s9] sm:$0xff] %vm239_vm1, %v5500_v23  ;;  %1801 = vst.msk [vmem:[%s5481_s9 + $0x8] sm:$0xff] %vm239_vm1, %v5503_v24  ;;  %v5519_v26 = vld [vmem:[%s5399_s27 + $0x68] sm:$0xff]  ;;  %v5522_v27 = vld [vmem:[%s5399_s27 + $0x39] sm:$0xff] }
  0x1a   : > { %4903 = vmatprep.mubr.msk.f32.mxu1 %vm239_vm1, %v5447_v14  ;;  %v5525_v28 = vld [vmem:[%s5399_s27 + $0x49] sm:$0xff]  ;;  %1802 = vst.msk [vmem:[%s5481_s9 + $0x10] sm:$0xff] %vm239_vm1, %v5506_v25  ;;  %v5538_v30 = vld [vmem:[%s5399_s27 + $0x78] sm:$0xff]  ;;  %1803 = vst.msk [vmem:[%s5481_s9 + $0x18] sm:$0xff] %vm239_vm1, %v5522_v27 }
  0x1b   : > { %v5535_v29 = vld [vmem:[%s5399_s27 + $0x128] sm:$0xff]  ;;  %v5541_v31 = vld [vmem:[%s5399_s27 + $0x51] sm:$0xff]  ;;  %1804 = vst.msk [vmem:[%s5481_s9 + $0x20] sm:$0xff] %vm239_vm1, %v5525_v28  ;;  %v5562_v35 = vld [vmem:[%s5399_s27 + $0x79] sm:$0xff] }
  0x1c   : > { %4880 = vmatmul.mubr.msk.f32.gmra.mxu0 %vm239_vm1, %v5462_v15  ;;  %v5550_v32 = vld [vmem:[%s5399_s27 + $0x138] sm:$0xff]  ;;  %v5553_v33 = vld [vmem:[%s5399_s27 + $0x61] sm:$0xff]  ;;  %v5556_v34 = vld [vmem:[%s5399_s27 + $0x69] sm:$0xff]  ;;  %1805 = vst.msk [vmem:[%s5481_s9 + $0x28] sm:$0xff] %vm239_vm1, %v5541_v31 }
  0x1d   : > { %4904 = vmatmul.mubr.msk.f32.gmra.mxu1 %vm239_vm1, %v5465_v16  ;;  %4882 = vmatprep.mubr.msk.f32.mxu0 %vm239_vm1, %v5469_v17  ;;  %1806 = vst.msk [vmem:[%s5481_s9 + $0x30] sm:$0xff] %vm239_vm1, %v5553_v33  ;;  %1807 = vst.msk [vmem:[%s5481_s9 + $0x38] sm:$0xff] %vm239_vm1, %v5556_v34  ;;  %v5575_v36 = vld [vmem:[%s5399_s27 + $0x80] sm:$0xff]  ;;  %v5581_v38 = vld [vmem:[%s5399_s27 + $0x91] sm:$0xff] }
  0x1e   : > { %4906 = vmatprep.mubr.msk.f32.mxu1 %vm239_vm1, %v5472_v18  ;;  %v5578_v37 = vld [vmem:[%s5399_s27 + $0x81] sm:$0xff]  ;;  %1808 = vst.msk [vmem:[%s5481_s9 + $0x40] sm:$0xff] %vm239_vm1, %v5562_v35  ;;  %v5594_v40 = vld [vmem:[%s5399_s27 + $0x90] sm:$0xff]  ;;  %v5597_v41 = vld [vmem:[%s5399_s27 + $0x99] sm:$0xff] }
  0x1f   : > { %v5591_v39 = vld [vmem:[%s5399_s27 + $0x140] sm:$0xff]  ;;  %1809 = vst.msk [vmem:[%s5481_s9 + $0x48] sm:$0xff] %vm239_vm1, %v5578_v37  ;;  %1810 = vst.msk [vmem:[%s5481_s9 + $0x50] sm:$0xff] %vm239_vm1, %v5581_v38  ;;  %v5606_v42 = vld [vmem:[%s5399_s27 + $0x150] sm:$0xff] }
  0x20   : > { %4883 = vmatmul.mubr.msk.f32.gmra.mxu0 %vm239_vm1, %v5488_v19  ;;  %7081 = vst [vmem:[#allocation3_spill] sm:$0xff] %v5591_v39  ;;  %7082 = vst [vmem:[#allocation4_spill] sm:$0xff] %v5606_v42  ;;  %v5609_v43 = vld [vmem:[%s5399_s27 + $0xa9] sm:$0xff]  ;;  %v5612_v44 = vld [vmem:[%s5399_s27 + $0xb1] sm:$0xff] }
  0x21   : > { %4907 = vmatmul.mubr.msk.f32.gmra.mxu1 %vm239_vm1, %v5491_v20  ;;  %4885 = vmatprep.mubr.msk.f32.mxu0 %vm239_vm1, %v5494_v21  ;;  %1811 = vst.msk [vmem:[%s5481_s9 + $0x58] sm:$0xff] %vm239_vm1, %v5597_v41  ;;  %v5618_v45 = vld [vmem:[%s5399_s27 + $0xc1] sm:$0xff]  ;;  %1812 = vst.msk [vmem:[%s5481_s9 + $0x60] sm:$0xff] %vm239_vm1, %v5609_v43  ;;  %v5631_v46 = vld [vmem:[%s5399_s27 + $0x98] sm:$0xff] }
  0x22   : > { %4909 = vmatprep.mubr.msk.f32.mxu1 %vm239_vm1, %v5497_v22  ;;  %1813 = vst.msk [vmem:[%s5481_s9 + $0x68] sm:$0xff] %vm239_vm1, %v5612_v44  ;;  %v5634_v47 = vld [vmem:[%s5399_s27 + $0xc9] sm:$0xff]  ;;  %v5637_v48 = vld [vmem:[%s5399_s27 + $0xd9] sm:$0xff]  ;;  %1814 = vst.msk [vmem:[%s5481_s9 + $0x70] sm:$0xff] %vm239_vm1, %v5618_v45 }
  0x23   : > { %v5647_v49 = vld [vmem:[%s5399_s27 + $0x158] sm:$0xff]  ;;  %v5650_v50 = vld [vmem:[%s5399_s27 + $0xa8] sm:$0xff]  ;;  %1815 = vst.msk [vmem:[%s5481_s9 + $0x78] sm:$0xff] %vm239_vm1, %v5634_v47  ;;  %1816 = vst.msk [vmem:[%s5481_s9 + $0x80] sm:$0xff] %vm239_vm1, %v5637_v48 }
  0x24   : > { %4886 = vmatmul.mubr.msk.f32.gmra.mxu0 %vm239_vm1, %v5519_v26  ;;  %7083 = vst [vmem:[#allocation5_spill] sm:$0xff] %v5647_v49  ;;  %v5653_v51 = vld [vmem:[%s5399_s27 + $0xe1] sm:$0xff]  ;;  %v5665_v53 = vld [vmem:[%s5399_s27 + $0xf1] sm:$0xff]  ;;  %v5668_v54 = vld [vmem:[%s5399_s27 + $0xf9] sm:$0xff] }
  0x25   : > { %4910 = vmatmul.mubr.msk.f32.gmra.mxu1 %vm239_vm1, %v5535_v29  ;;  %4888 = vmatprep.mubr.msk.f32.mxu0 %vm239_vm1, %v5538_v30  ;;  %v5662_v52 = vld [vmem:[%s5399_s27 + $0x168] sm:$0xff]  ;;  %1817 = vst.msk [vmem:[%s5481_s9 + $0x88] sm:$0xff] %vm239_vm1, %v5653_v51  ;;  %1818 = vst.msk [vmem:[%s5481_s9 + $0x90] sm:$0xff] %vm239_vm1, %v5665_v53  ;;  %v5687_v56 = vld [vmem:[%s5399_s27 + $0xb0] sm:$0xff] }
  0x26   : > { %4912 = vmatprep.mubr.msk.f32.mxu1 %vm239_vm1, %v5550_v32  ;;  %7084 = vst [vmem:[#allocation6_spill] sm:$0xff] %v5662_v52  ;;  %v5674_v55 = vld [vmem:[%s5399_s27 + $0x109] sm:$0xff]  ;;  %1819 = vst.msk [vmem:[%s5481_s9 + $0x98] sm:$0xff] %vm239_vm1, %v5668_v54  ;;  %v5690_v57 = vld [vmem:[%s5399_s27 + $0x111] sm:$0xff] }
  0x27   : > { %v5693_v58 = vld [vmem:[%s5399_s27 + $0x121] sm:$0xff]  ;;  %1820 = vst.msk [vmem:[%s5481_s9 + $0xa0] sm:$0xff] %vm239_vm1, %v5674_v55  ;;  %v5703_v59 = vld [vmem:[%s5399_s27 + $0x170] sm:$0xff]  ;;  %1821 = vst.msk [vmem:[%s5481_s9 + $0xa8] sm:$0xff] %vm239_vm1, %v5690_v57 }
  0x28   : > { %4889 = vmatmul.mubr.msk.f32.gmra.mxu0 %vm239_vm1, %v5575_v36  ;;  %7085 = vst [vmem:[#allocation7_spill] sm:$0xff] %v5703_v59  ;;  %v597_v60 = vld [vmem:[%s5399_s27 + $0x1] sm:$0xff]  ;;  %v5707_v61 = vld [vmem:[%s5399_s27 + $0x129] sm:$0xff]  ;;  %1822 = vst.msk [vmem:[%s5481_s9 + $0xb0] sm:$0xff] %vm239_vm1, %v5693_v58 }
  0x29   : > { %4913 = vmatmul.mubr.msk.f32.gmra.mxu1 %vm239_vm1, %v5591_v39  ;;  %4891 = vmatprep.mubr.msk.f32.mxu0 %vm239_vm1, %v5594_v40  ;;  %v987_v62 = vld [vmem:[%s5399_s27 + $0x2] sm:$0xff]  ;;  %v5717_v63 = vld [vmem:[%s5399_s27 + $0x139] sm:$0xff]  ;;  %1823 = vst.msk [vmem:[%s5481_s9 + $0xb8] sm:$0xff] %vm239_vm1, %v5707_v61  ;;  %v5726_v1 = vld [vmem:[%s5399_s27 + $0x151] sm:$0xff] }
  0x2a   : > { %4915 = vmatprep.mubr.msk.f32.mxu1 %vm239_vm1, %v5606_v42  ;;  %v5720_v0 = vld [vmem:[%s5399_s27 + $0x141] sm:$0xff]  ;;  %1824 = vst.msk [vmem:[%s5481_s9 + $0xc0] sm:$0xff] %vm239_vm1, %v5717_v63  ;;  %v5739_v2 = vld [vmem:[%s5399_s27 + $0x159] sm:$0xff]  ;;  %v5742_v3 = vld [vmem:[%s5399_s27 + $0x169] sm:$0xff] }
  0x2b   : > { %1825 = vst.msk [vmem:[%s5481_s9 + $0xc8] sm:$0xff] %vm239_vm1, %v5720_v0  ;;  %1826 = vst.msk [vmem:[%s5481_s9 + $0xd0] sm:$0xff] %vm239_vm1, %v5726_v1  ;;  %v598_v5 = vld [vmem:[%s5399_s27 + $0x9] sm:$0xff]  ;;  %v5780_v42 = vld [vmem:[%s7032_s1 + $0x14] sm:$0xf] }
  0x2c   : > { %4892 = vmatmul.mubr.msk.f32.gmra.mxu0 %vm239_vm1, %v5631_v46  ;;  %1827 = vst.msk [vmem:[%s5481_s9 + $0xd8] sm:$0xff] %vm239_vm1, %v5739_v2  ;;  %1828 = vst.msk [vmem:[%s5481_s9 + $0xe0] sm:$0xff] %vm239_vm1, %v5742_v3  ;;  %v5785_v39 = vld [vmem:[%s7032_s1 + $0x18] sm:$0xf] }
  0x2d   : > { %4916 = vmatmul.mubr.msk.f32.gmra.mxu1 %vm239_vm1, %v5647_v49  ;;  %4894 = vmatprep.mubr.msk.f32.mxu0 %vm239_vm1, %v5650_v50  ;;  %v5752_v49 = vld [vmem:[%s5399_s27 + $0x171] sm:$0xff] }
  0x2e   : > { %4918 = vmatprep.mubr.msk.f32.mxu1 %vm239_vm1, %v5662_v52  ;;  %v988_v52 = vld [vmem:[%s5399_s27 + $0xa] sm:$0xff]  ;;  %1829 = vst.msk [vmem:[%s5481_s9 + $0xe8] sm:$0xff] %vm239_vm1, %v5752_v49 }
  0x30   : > { %4895 = vmatmul.mubr.msk.f32.gmra.mxu0 %vm239_vm1, %v5687_v56 }
  0x31   : > { %4919 = vmatmul.mubr.msk.f32.gmra.mxu1 %vm239_vm1, %v5703_v59  ;;  %4973 = vmatprep.mubr.msk.f32.mxu0 %vm239_vm1, %v987_v62  ;;  %v5764_v59 = vld [vmem:[%s5399_s27 + $0x181] sm:$0xff]  ;;  %v5773_v62 = vld [vmem:[%s5399_s27 + $0x189] sm:$0xff] }
  0x32   : > { %4923 = vmatprep.mubr.msk.f32.mxu1 %vm239_vm1, %v597_v60  ;;  %v5767_v60 = vld [vmem:[%s5399_s27 + $0x1a] sm:$0xff]  ;;  %1830 = vst.msk [vmem:[%s5481_s9 + $0xf0] sm:$0xff] %vm239_vm1, %v5764_v59  ;;  %1831 = vst.msk [vmem:[%s5481_s9 + $0xf8] sm:$0xff] %vm239_vm1, %v5773_v62 }
  0x33   : > { %7086 = vst [vmem:[#allocation8_spill] sm:$0xff] %v5767_v60 }
  0x34   : > { %4974 = vmatmul.mubr.msk.f32.vlgmr.msra.gmra.mxu0 %vm239_vm1, %v988_v52  ;;  %v5795_v52 = vld [vmem:[%s5399_s27 + $0x22] sm:$0xff] }
  0x35   : > { %4924 = vmatmul.mubr.msk.f32.vlgmr.msra.gmra.mxu1 %vm239_vm1, %v598_v5  ;;  %5072 = vmatpush3.msk.msra.mxu0 %vm336_vm0, %v5429_v10  ;;  %7087 = vst [vmem:[#allocation9_spill] sm:$0xff] %v5795_v52  ;;  %v5802_v5 = vld [vmem:[%s5399_s27 + $0x32] sm:$0xff]  ;;  %v5820_v10 = vld [vmem:[%s5399_s27 + $0x4a] sm:$0xff] }
  0x36   : > { %5022 = vmatpush3.msk.msra.mxu1 %vm336_vm0, %v5424_v9  ;;  %4926 = vmatprep.mubr.msk.f32.mxu1 %vm239_vm1, %v5500_v23  ;;  %7088 = vst [vmem:[#allocation10_spill] sm:$0xff] %v5802_v5  ;;  %v5817_v9 = vld [vmem:[%s5399_s27 + $0x3a] sm:$0xff]  ;;  %7090 = vst [vmem:[#allocation12_spill] sm:$0xff] %v5820_v10 }
  0x37   : > { %4976 = vmatprep.mubr.msk.f32.mxu0 %vm239_vm1, %v5767_v60  ;;  %5121 = vmatprep.subr.msk.mxu1 %vm336_vm0, %v5780_v42  ;;  %7089 = vst [vmem:[#allocation11_spill] sm:$0xff] %v5817_v9  ;;  %v5988_v60 = vld [vmem:[%s5399_s27 + $0x16a] sm:$0xff] }
  0x38   : > { %5171 = vmatprep.subr.msk.mxu0 %vm336_vm0, %v5785_v39  ;;  %4977 = vmatmul.mubr.msk.f32.gmra.mxu0 %vm239_vm1, %v5795_v52  ;;  %v5831_v52 = vld [vmem:[%s5399_s27 + $0x52] sm:$0xff]  ;;  %7111 = vst [vmem:[#allocation33_spill] sm:$0xff] %v5988_v60 }
  0x39   : > { %4927 = vmatmul.mubr.msk.f32.gmra.mxu1 %vm239_vm1, %v5503_v24  ;;  %4979 = vmatprep.mubr.msk.f32.mxu0 %vm239_vm1, %v5802_v5  ;;  %7091 = vst [vmem:[#allocation13_spill] sm:$0xff] %v5831_v52  ;;  %v5834_v5 = vld [vmem:[%s5399_s27 + $0x62] sm:$0xff] }
  0x3a   : > { %4929 = vmatprep.mubr.msk.f32.mxu1 %vm239_vm1, %v5506_v25  ;;  %7092 = vst [vmem:[#allocation14_spill] sm:$0xff] %v5834_v5 }
  0x3c   : > { %4980 = vmatmul.mubr.msk.f32.gmra.mxu0 %vm239_vm1, %v5817_v9  ;;  %v5845_v9 = vld [vmem:[%s5399_s27 + $0x6a] sm:$0xff] }
  0x3d   : > { %4930 = vmatmul.mubr.msk.f32.gmra.mxu1 %vm239_vm1, %v5522_v27  ;;  %4982 = vmatprep.mubr.msk.f32.mxu0 %vm239_vm1, %v5820_v10  ;;  %7093 = vst [vmem:[#allocation15_spill] sm:$0xff] %v5845_v9  ;;  %v5848_v10 = vld [vmem:[%s5399_s27 + $0x7a] sm:$0xff] }
  0x3e   : > { %4932 = vmatprep.mubr.msk.f32.mxu1 %vm239_vm1, %v5525_v28  ;;  %7094 = vst [vmem:[#allocation16_spill] sm:$0xff] %v5848_v10 }
  0x40   : > { %4983 = vmatmul.mubr.msk.f32.gmra.mxu0 %vm239_vm1, %v5831_v52  ;;  %v5859_v52 = vld [vmem:[%s5399_s27 + $0x82] sm:$0xff] }
  0x41   : > { %4933 = vmatmul.mubr.msk.f32.gmra.mxu1 %vm239_vm1, %v5541_v31  ;;  %4985 = vmatprep.mubr.msk.f32.mxu0 %vm239_vm1, %v5834_v5  ;;  %7095 = vst [vmem:[#allocation17_spill] sm:$0xff] %v5859_v52  ;;  %v5862_v5 = vld [vmem:[%s5399_s27 + $0x92] sm:$0xff] }
  0x42   : > { %4935 = vmatprep.mubr.msk.f32.mxu1 %vm239_vm1, %v5553_v33  ;;  %7096 = vst [vmem:[#allocation18_spill] sm:$0xff] %v5862_v5 }
  0x44   : > { %4986 = vmatmul.mubr.msk.f32.gmra.mxu0 %vm239_vm1, %v5845_v9  ;;  %v5873_v9 = vld [vmem:[%s5399_s27 + $0x9a] sm:$0xff] }
  0x45   : > { %4936 = vmatmul.mubr.msk.f32.gmra.mxu1 %vm239_vm1, %v5556_v34  ;;  %4988 = vmatprep.mubr.msk.f32.mxu0 %vm239_vm1, %v5848_v10  ;;  %7097 = vst [vmem:[#allocation19_spill] sm:$0xff] %v5873_v9  ;;  %v5876_v10 = vld [vmem:[%s5399_s27 + $0xaa] sm:$0xff] }
  0x46   : > { %4938 = vmatprep.mubr.msk.f32.mxu1 %vm239_vm1, %v5562_v35  ;;  %7098 = vst [vmem:[#allocation20_spill] sm:$0xff] %v5876_v10 }
  0x48   : > { %4989 = vmatmul.mubr.msk.f32.gmra.mxu0 %vm239_vm1, %v5859_v52  ;;  %v5887_v52 = vld [vmem:[%s5399_s27 + $0xb2] sm:$0xff] }
  0x49   : > { %4939 = vmatmul.mubr.msk.f32.gmra.mxu1 %vm239_vm1, %v5578_v37  ;;  %4991 = vmatprep.mubr.msk.f32.mxu0 %vm239_vm1, %v5862_v5  ;;  %7099 = vst [vmem:[#allocation21_spill] sm:$0xff] %v5887_v52  ;;  %v5890_v5 = vld [vmem:[%s5399_s27 + $0xc2] sm:$0xff] }
  0x4a   : > { %4941 = vmatprep.mubr.msk.f32.mxu1 %vm239_vm1, %v5581_v38  ;;  %7100 = vst [vmem:[#allocation22_spill] sm:$0xff] %v5890_v5 }
  0x4c   : > { %4992 = vmatmul.mubr.msk.f32.gmra.mxu0 %vm239_vm1, %v5873_v9  ;;  %v5901_v9 = vld [vmem:[%s5399_s27 + $0xca] sm:$0xff] }
  0x4d   : > { %4942 = vmatmul.mubr.msk.f32.gmra.mxu1 %vm239_vm1, %v5597_v41  ;;  %4994 = vmatprep.mubr.msk.f32.mxu0 %vm239_vm1, %v5876_v10  ;;  %7101 = vst [vmem:[#allocation23_spill] sm:$0xff] %v5901_v9  ;;  %v5904_v10 = vld [vmem:[%s5399_s27 + $0xda] sm:$0xff] }
  0x4e   : > { %4944 = vmatprep.mubr.msk.f32.mxu1 %vm239_vm1, %v5609_v43  ;;  %7102 = vst [vmem:[#allocation24_spill] sm:$0xff] %v5904_v10 }
  0x50   : > { %4995 = vmatmul.mubr.msk.f32.gmra.mxu0 %vm239_vm1, %v5887_v52  ;;  %v5915_v52 = vld [vmem:[%s5399_s27 + $0xe2] sm:$0xff] }
  0x51   : > { %4945 = vmatmul.mubr.msk.f32.gmra.mxu1 %vm239_vm1, %v5612_v44  ;;  %4997 = vmatprep.mubr.msk.f32.mxu0 %vm239_vm1, %v5890_v5  ;;  %7103 = vst [vmem:[#allocation25_spill] sm:$0xff] %v5915_v52  ;;  %v5918_v5 = vld [vmem:[%s5399_s27 + $0xf2] sm:$0xff] }
  0x52   : > { %4947 = vmatprep.mubr.msk.f32.mxu1 %vm239_vm1, %v5618_v45  ;;  %7104 = vst [vmem:[#allocation26_spill] sm:$0xff] %v5918_v5 }
  0x54   : > { %4998 = vmatmul.mubr.msk.f32.gmra.mxu0 %vm239_vm1, %v5901_v9  ;;  %v5929_v9 = vld [vmem:[%s5399_s27 + $0xfa] sm:$0xff] }
  0x55   : > { %4948 = vmatmul.mubr.msk.f32.gmra.mxu1 %vm239_vm1, %v5634_v47  ;;  %5000 = vmatprep.mubr.msk.f32.mxu0 %vm239_vm1, %v5904_v10  ;;  %7105 = vst [vmem:[#allocation27_spill] sm:$0xff] %v5929_v9  ;;  %v5932_v10 = vld [vmem:[%s5399_s27 + $0x10a] sm:$0xff] }
  0x56   : > { %4950 = vmatprep.mubr.msk.f32.mxu1 %vm239_vm1, %v5637_v48  ;;  %7106 = vst [vmem:[#allocation28_spill] sm:$0xff] %v5932_v10 }
  0x58   : > { %5001 = vmatmul.mubr.msk.f32.gmra.mxu0 %vm239_vm1, %v5915_v52  ;;  %v5943_v52 = vld [vmem:[%s5399_s27 + $0x112] sm:$0xff] }
  0x59   : > { %4951 = vmatmul.mubr.msk.f32.gmra.mxu1 %vm239_vm1, %v5653_v51  ;;  %5003 = vmatprep.mubr.msk.f32.mxu0 %vm239_vm1, %v5918_v5  ;;  %7107 = vst [vmem:[#allocation29_spill] sm:$0xff] %v5943_v52  ;;  %v5946_v5 = vld [vmem:[%s5399_s27 + $0x122] sm:$0xff] }
  0x5a   : > { %4953 = vmatprep.mubr.msk.f32.mxu1 %vm239_vm1, %v5665_v53  ;;  %7108 = vst [vmem:[#allocation30_spill] sm:$0xff] %v5946_v5 }
  0x5c   : > { %5004 = vmatmul.mubr.msk.f32.gmra.mxu0 %vm239_vm1, %v5929_v9  ;;  %v5957_v9 = vld [vmem:[%s5399_s27 + $0x12a] sm:$0xff] }
  0x5d   : > { %4954 = vmatmul.mubr.msk.f32.gmra.mxu1 %vm239_vm1, %v5668_v54  ;;  %5006 = vmatprep.mubr.msk.f32.mxu0 %vm239_vm1, %v5932_v10  ;;  %7109 = vst [vmem:[#allocation31_spill] sm:$0xff] %v5957_v9  ;;  %v5960_v10 = vld [vmem:[%s5399_s27 + $0x13a] sm:$0xff] }
  0x5e   : > { %4956 = vmatprep.mubr.msk.f32.mxu1 %vm239_vm1, %v5674_v55 }
  0x60   : > { %5007 = vmatmul.mubr.msk.f32.gmra.mxu0 %vm239_vm1, %v5943_v52  ;;  %v5971_v52 = vld [vmem:[%s5399_s27 + $0x142] sm:$0xff] }
  0x61   : > { %4957 = vmatmul.mubr.msk.f32.gmra.mxu1 %vm239_vm1, %v5690_v57  ;;  %5009 = vmatprep.mubr.msk.f32.mxu0 %vm239_vm1, %v5946_v5  ;;  %7110 = vst [vmem:[#allocation32_spill] sm:$0xff] %v5971_v52  ;;  %v5974_v5 = vld [vmem:[%s5399_s27 + $0x152] sm:$0xff] }
  0x62   : > { %4959 = vmatprep.mubr.msk.f32.mxu1 %vm239_vm1, %v5693_v58 }
  0x64   : > { %5010 = vmatmul.mubr.msk.f32.gmra.mxu0 %vm239_vm1, %v5957_v9  ;;  %v5985_v9 = vld [vmem:[%s5399_s27 + $0x15a] sm:$0xff] }
  0x65   : > { %4960 = vmatmul.mubr.msk.f32.gmra.mxu1 %vm239_vm1, %v5707_v61  ;;  %5012 = vmatprep.mubr.msk.f32.mxu0 %vm239_vm1, %v5960_v10 }
  0x66   : > { %4962 = vmatprep.mubr.msk.f32.mxu1 %vm239_vm1, %v5717_v63 }
  0x68   : > { %5013 = vmatmul.mubr.msk.f32.gmra.mxu0 %vm239_vm1, %v5971_v52  ;;  %v5999_v52 = vld [vmem:[%s5399_s27 + $0x172] sm:$0xff] }
  0x69   : > { %4963 = vmatmul.mubr.msk.f32.gmra.mxu1 %vm239_vm1, %v5720_v0  ;;  %5015 = vmatprep.mubr.msk.f32.mxu0 %vm239_vm1, %v5974_v5  ;;  %7112 = vst [vmem:[#allocation34_spill] sm:$0xff] %v5999_v52 }
  0x6a   : > { %4965 = vmatprep.mubr.msk.f32.mxu1 %vm239_vm1, %v5726_v1 }
  0x6c   : > { %5016 = vmatmul.mubr.msk.f32.gmra.mxu0 %vm239_vm1, %v5985_v9 }
  0x6d   : > { %4966 = vmatmul.mubr.msk.f32.gmra.mxu1 %vm239_vm1, %v5739_v2  ;;  %5018 = vmatprep.mubr.msk.f32.mxu0 %vm239_vm1, %v5988_v60  ;;  %v6016_v60 = vld [vmem:[%s7032_s1 + $0x1c] sm:$0xf] }
  0x6e   : > { %4968 = vmatprep.mubr.msk.f32.mxu1 %vm239_vm1, %v5742_v3 }
  0x70   : > { %5019 = vmatmul.mubr.msk.f32.gmra.mxu0 %vm239_vm1, %v5999_v52  ;;  %v6021_v52 = vld [vmem:[%s7032_s1 + $0x20] sm:$0xf] }
  0x71   : > { %4969 = vmatmul.mubr.msk.f32.gmra.mxu1 %vm239_vm1, %v5752_v49  ;;  %5073 = vmatprep.mubr.msk.f32.mxu0 %vm239_vm1, %v5500_v23  ;;  %v7115_v23 = vld [vmem:[#allocation5_spill] sm:$0xff] }
  0x72   : > { %5023 = vmatprep.mubr.msk.f32.mxu1 %vm239_vm1, %v5413_v7  ;;  %v7113_v7 = vld [vmem:[#allocation3_spill] sm:$0xff] }
  0x74   : > { %5074 = vmatmul.mubr.msk.f32.vlgmr.msra.gmra.mxu0 %vm239_vm1, %v5503_v24  ;;  %v7116_v24 = vld [vmem:[#allocation6_spill] sm:$0xff] }
  0x75   : > { %5024 = vmatmul.mubr.msk.f32.vlgmr.msra.gmra.mxu1 %vm239_vm1, %v5434_v11  ;;  %5172 = vmatpush3.msk.msra.mxu0 %vm336_vm0, %v5785_v39  ;;  %v7114_v11 = vld [vmem:[#allocation4_spill] sm:$0xff]  ;;  %v6140_v39 = vld [vmem:[%s5399_s27 + $0x180] sm:$0xff] }
  0x76   : > { %5122 = vmatpush3.msk.msra.mxu1 %vm336_vm0, %v5780_v42  ;;  %5026 = vmatprep.mubr.msk.f32.mxu1 %vm239_vm1, %v5444_v13  ;;  %v6151_v42 = vld [vmem:[%s5399_s27 + $0x188] sm:$0xff] }
  0x77   : > { %5076 = vmatprep.mubr.msk.f32.mxu0 %vm239_vm1, %v5506_v25  ;;  %5221 = vmatprep.subr.msk.mxu1 %vm336_vm0, %v6016_v60 }
  0x78   : > { %5271 = vmatprep.subr.msk.mxu0 %vm336_vm0, %v6021_v52  ;;  %5077 = vmatmul.mubr.msk.f32.gmra.mxu0 %vm239_vm1, %v5522_v27 }
  0x79   : > { %5027 = vmatmul.mubr.msk.f32.gmra.mxu1 %vm239_vm1, %v5462_v15  ;;  %5079 = vmatprep.mubr.msk.f32.mxu0 %vm239_vm1, %v5525_v28 }
  0x7a   : > { %5029 = vmatprep.mubr.msk.f32.mxu1 %vm239_vm1, %v5469_v17 }
  0x7c   : > { %5080 = vmatmul.mubr.msk.f32.gmra.mxu0 %vm239_vm1, %v5541_v31 }
  0x7d   : > { %5030 = vmatmul.mubr.msk.f32.gmra.mxu1 %vm239_vm1, %v5488_v19  ;;  %5082 = vmatprep.mubr.msk.f32.mxu0 %vm239_vm1, %v5553_v33 }
  0x7e   : > { %5032 = vmatprep.mubr.msk.f32.mxu1 %vm239_vm1, %v5494_v21 }
  0x80   : > { %5083 = vmatmul.mubr.msk.f32.gmra.mxu0 %vm239_vm1, %v5556_v34 }
  0x81   : > { %5033 = vmatmul.mubr.msk.f32.gmra.mxu1 %vm239_vm1, %v5519_v26  ;;  %5085 = vmatprep.mubr.msk.f32.mxu0 %vm239_vm1, %v5562_v35 }
  0x82   : > { %5035 = vmatprep.mubr.msk.f32.mxu1 %vm239_vm1, %v5538_v30 }
  0x84   : > { %5086 = vmatmul.mubr.msk.f32.gmra.mxu0 %vm239_vm1, %v5578_v37 }
  0x85   : > { %5036 = vmatmul.mubr.msk.f32.gmra.mxu1 %vm239_vm1, %v5575_v36  ;;  %5088 = vmatprep.mubr.msk.f32.mxu0 %vm239_vm1, %v5581_v38 }
  0x86   : > { %5038 = vmatprep.mubr.msk.f32.mxu1 %vm239_vm1, %v5594_v40 }
  0x88   : > { %5089 = vmatmul.mubr.msk.f32.gmra.mxu0 %vm239_vm1, %v5597_v41  ;;  %v7117_v41 = vld [vmem:[#allocation7_spill] sm:$0xff] }
  0x89   : > { %5039 = vmatmul.mubr.msk.f32.gmra.mxu1 %vm239_vm1, %v5631_v46  ;;  %5091 = vmatprep.mubr.msk.f32.mxu0 %vm239_vm1, %v5609_v43  ;;  %v7118_v43 = vld [vmem:[#allocation8_spill] sm:$0xff] }
  0x8a   : > { %5041 = vmatprep.mubr.msk.f32.mxu1 %vm239_vm1, %v5650_v50 }
  0x8c   : > { %5092 = vmatmul.mubr.msk.f32.gmra.mxu0 %vm239_vm1, %v5612_v44  ;;  %v7119_v44 = vld [vmem:[#allocation9_spill] sm:$0xff] }
  0x8d   : > { %5042 = vmatmul.mubr.msk.f32.gmra.mxu1 %vm239_vm1, %v5687_v56  ;;  %5094 = vmatprep.mubr.msk.f32.mxu0 %vm239_vm1, %v5618_v45  ;;  %v7120_v45 = vld [vmem:[#allocation10_spill] sm:$0xff] }
  0x8e   : > { %5044 = vmatprep.mubr.msk.f32.mxu1 %vm239_vm1, %v5403_v4 }
  0x90   : > { %5095 = vmatmul.mubr.msk.f32.gmra.mxu0 %vm239_vm1, %v5634_v47  ;;  %v7121_v47 = vld [vmem:[#allocation11_spill] sm:$0xff] }
  0x91   : > { %5045 = vmatmul.mubr.msk.f32.gmra.mxu1 %vm239_vm1, %v5410_v6  ;;  %5097 = vmatprep.mubr.msk.f32.mxu0 %vm239_vm1, %v5637_v48  ;;  %v7124_v48 = vld [vmem:[#allocation14_spill] sm:$0xff] }
  0x92   : > { %5047 = vmatprep.mubr.msk.f32.mxu1 %vm239_vm1, %v5416_v8 }
  0x94   : > { %5098 = vmatmul.mubr.msk.f32.gmra.mxu0 %vm239_vm1, %v5653_v51  ;;  %v7135_v51 = vld [vmem:[#allocation25_spill] sm:$0xff] }
  0x95   : > { %5048 = vmatmul.mubr.msk.f32.gmra.mxu1 %vm239_vm1, %v5437_v12  ;;  %5100 = vmatprep.mubr.msk.f32.mxu0 %vm239_vm1, %v5665_v53 }
  0x96   : > { %5050 = vmatprep.mubr.msk.f32.mxu1 %vm239_vm1, %v5447_v14 }
  0x98   : > { %5101 = vmatmul.mubr.msk.f32.gmra.mxu0 %vm239_vm1, %v5668_v54 }
  0x99   : > { %5051 = vmatmul.mubr.msk.f32.gmra.mxu1 %vm239_vm1, %v5465_v16  ;;  %5103 = vmatprep.mubr.msk.f32.mxu0 %vm239_vm1, %v5674_v55  ;;  %v7137_v55 = vld [vmem:[#allocation27_spill] sm:$0xff] }
  0x9a   : > { %5053 = vmatprep.mubr.msk.f32.mxu1 %vm239_vm1, %v5472_v18 }
  0x9c   : > { %5104 = vmatmul.mubr.msk.f32.gmra.mxu0 %vm239_vm1, %v5690_v57 }
  0x9d   : > { %5054 = vmatmul.mubr.msk.f32.gmra.mxu1 %vm239_vm1, %v5491_v20  ;;  %5106 = vmatprep.mubr.msk.f32.mxu0 %vm239_vm1, %v5693_v58 }
  0x9e   : > { %5056 = vmatprep.mubr.msk.f32.mxu1 %vm239_vm1, %v5497_v22 }
  0xa0   : > { %5107 = vmatmul.mubr.msk.f32.gmra.mxu0 %vm239_vm1, %v5707_v61  ;;  %v7139_v61 = vld [vmem:[#allocation29_spill] sm:$0xff] }
  0xa1   : > { %5057 = vmatmul.mubr.msk.f32.gmra.mxu1 %vm239_vm1, %v5535_v29  ;;  %5109 = vmatprep.mubr.msk.f32.mxu0 %vm239_vm1, %v5717_v63 }
  0xa2   : > { %5059 = vmatprep.mubr.msk.f32.mxu1 %vm239_vm1, %v5550_v32 }
  0xa4   : > { %5110 = vmatmul.mubr.msk.f32.gmra.mxu0 %vm239_vm1, %v5720_v0 }
  0xa5   : > { %5060 = vmatmul.mubr.msk.f32.gmra.mxu1 %vm239_vm1, %v7113_v7  ;;  %5112 = vmatprep.mubr.msk.f32.mxu0 %vm239_vm1, %v5726_v1 }
  0xa6   : > { %5062 = vmatprep.mubr.msk.f32.mxu1 %vm239_vm1, %v7114_v11 }
  0xa8   : > { %5113 = vmatmul.mubr.msk.f32.gmra.mxu0 %vm239_vm1, %v5739_v2  ;;  %v7141_v2 = vld [vmem:[#allocation31_spill] sm:$0xff] }
  0xa9   : > { %5063 = vmatmul.mubr.msk.f32.gmra.mxu1 %vm239_vm1, %v7115_v23  ;;  %5115 = vmatprep.mubr.msk.f32.mxu0 %vm239_vm1, %v5742_v3 }
  0xaa   : > { %5065 = vmatprep.mubr.msk.f32.mxu1 %vm239_vm1, %v7116_v24 }
  0xac   : > { %5116 = vmatmul.mubr.msk.f32.gmra.mxu0 %vm239_vm1, %v5752_v49  ;;  %v7133_v49 = vld [vmem:[#allocation23_spill] sm:$0xff] }
  0xad   : > { %5066 = vmatmul.mubr.msk.f32.gmra.mxu1 %vm239_vm1, %v7117_v41  ;;  %5118 = vmatprep.mubr.msk.f32.mxu0 %vm239_vm1, %v5764_v59 }
  0xae   : > { %5068 = vmatprep.mubr.msk.f32.mxu1 %vm239_vm1, %v6140_v39 }
  0xb0   : > { %5119 = vmatmul.mubr.msk.f32.gmra.mxu0 %vm239_vm1, %v5773_v62 }
  0xb1   : > { %5069 = vmatmul.mubr.msk.f32.gmra.mxu1 %vm239_vm1, %v6151_v42  ;;  %5173 = vmatprep.mubr.msk.f32.mxu0 %vm239_vm1, %v5444_v13  ;;  %v7122_v13 = vld [vmem:[#allocation12_spill] sm:$0xff] }
  0xb2   : > { %5123 = vmatprep.mubr.msk.f32.mxu1 %vm239_vm1, %v7118_v43 }
  0xb4   : > { %5174 = vmatmul.mubr.msk.f32.vlgmr.msra.gmra.mxu0 %vm239_vm1, %v5462_v15  ;;  %v7123_v15 = vld [vmem:[#allocation13_spill] sm:$0xff] }
  0xb5   : > { %5124 = vmatmul.mubr.msk.f32.vlgmr.msra.gmra.mxu1 %vm239_vm1, %v7119_v44  ;;  %5272 = vmatpush3.msk.msra.mxu0 %vm336_vm0, %v6021_v52  ;;  %v7142_v52 = vld [vmem:[#allocation32_spill] sm:$0xff] }
  0xb6   : > { %5222 = vmatpush3.msk.msra.mxu1 %vm336_vm0, %v6016_v60  ;;  %5126 = vmatprep.mubr.msk.f32.mxu1 %vm239_vm1, %v7120_v45  ;;  %v6326_v44 = vld [vmem:[%s5399_s27 + $0x182] sm:$0xff] }
  0xb7   : > { %5176 = vmatprep.mubr.msk.f32.mxu0 %vm239_vm1, %v5469_v17  ;;  %v7125_v17 = vld [vmem:[#allocation15_spill] sm:$0xff] }
  0xb8   : > { %5177 = vmatmul.mubr.msk.f32.gmra.mxu0 %vm239_vm1, %v5488_v19  ;;  %v7126_v19 = vld [vmem:[#allocation16_spill] sm:$0xff] }
  0xb9   : > { %5127 = vmatmul.mubr.msk.f32.gmra.mxu1 %vm239_vm1, %v7121_v47  ;;  %5179 = vmatprep.mubr.msk.f32.mxu0 %vm239_vm1, %v5494_v21  ;;  %v7127_v21 = vld [vmem:[#allocation17_spill] sm:$0xff] }
  0xba   : > { %5129 = vmatprep.mubr.msk.f32.mxu1 %vm239_vm1, %v7122_v13 }
  0xbc   : > { %5180 = vmatmul.mubr.msk.f32.gmra.mxu0 %vm239_vm1, %v5519_v26  ;;  %v7128_v26 = vld [vmem:[#allocation18_spill] sm:$0xff] }
  0xbd   : > { %5130 = vmatmul.mubr.msk.f32.gmra.mxu1 %vm239_vm1, %v7123_v15  ;;  %5182 = vmatprep.mubr.msk.f32.mxu0 %vm239_vm1, %v5538_v30  ;;  %v7129_v30 = vld [vmem:[#allocation19_spill] sm:$0xff] }
  0xbe   : > { %5132 = vmatprep.mubr.msk.f32.mxu1 %vm239_vm1, %v7124_v48 }
  0xc0   : > { %5183 = vmatmul.mubr.msk.f32.gmra.mxu0 %vm239_vm1, %v5575_v36  ;;  %v7130_v36 = vld [vmem:[#allocation20_spill] sm:$0xff] }
  0xc1   : > { %5133 = vmatmul.mubr.msk.f32.gmra.mxu1 %vm239_vm1, %v7125_v17  ;;  %5185 = vmatprep.mubr.msk.f32.mxu0 %vm239_vm1, %v5594_v40  ;;  %v7131_v40 = vld [vmem:[#allocation21_spill] sm:$0xff] }
  0xc2   : > { %5135 = vmatprep.mubr.msk.f32.mxu1 %vm239_vm1, %v7126_v19 }
  0xc4   : > { %5186 = vmatmul.mubr.msk.f32.gmra.mxu0 %vm239_vm1, %v5631_v46  ;;  %v7132_v46 = vld [vmem:[#allocation22_spill] sm:$0xff] }
  0xc5   : > { %5136 = vmatmul.mubr.msk.f32.gmra.mxu1 %vm239_vm1, %v7127_v21  ;;  %5188 = vmatprep.mubr.msk.f32.mxu0 %vm239_vm1, %v5650_v50  ;;  %v7134_v50 = vld [vmem:[#allocation24_spill] sm:$0xff] }
  0xc6   : > { %5138 = vmatprep.mubr.msk.f32.mxu1 %vm239_vm1, %v7128_v26  ;;  %v4403_v26 = vld [vmem:[%s5399_s27 + $0x198] sm:$0xff] }
  0xc8   : > { %5189 = vmatmul.mubr.msk.f32.gmra.mxu0 %vm239_vm1, %v5687_v56 }
  0xc9   : > { %5139 = vmatmul.mubr.msk.f32.gmra.mxu1 %vm239_vm1, %v7129_v30  ;;  %5191 = vmatprep.mubr.msk.f32.mxu0 %vm239_vm1, %v5403_v4 }
  0xca   : > { %5141 = vmatprep.mubr.msk.f32.mxu1 %vm239_vm1, %v7130_v36 }
  0xcc   : > { %5192 = vmatmul.mubr.msk.f32.gmra.mxu0 %vm239_vm1, %v5410_v6 }
  0xcd   : > { %5142 = vmatmul.mubr.msk.f32.gmra.mxu1 %vm239_vm1, %v7131_v40  ;;  %5194 = vmatprep.mubr.msk.f32.mxu0 %vm239_vm1, %v5416_v8  ;;  %v7136_v8 = vld [vmem:[#allocation26_spill] sm:$0xff] }
  0xce   : > { %5144 = vmatprep.mubr.msk.f32.mxu1 %vm239_vm1, %v7132_v46 }
  0xd0   : > { %5195 = vmatmul.mubr.msk.f32.gmra.mxu0 %vm239_vm1, %v5437_v12 }
  0xd1   : > { %5145 = vmatmul.mubr.msk.f32.gmra.mxu1 %vm239_vm1, %v7133_v49  ;;  %5197 = vmatprep.mubr.msk.f32.mxu0 %vm239_vm1, %v5447_v14  ;;  %v6351_v49 = vld [vmem:[%s7033_s2] ss:$0 sm:$0xff] }
  0xd2   : > { %5147 = vmatprep.mubr.msk.f32.mxu1 %vm239_vm1, %v7134_v50 }
  0xd4   : > { %v6229_v4 = vpop.f32.mrf.mxu0  ;;  %5198 = vmatmul.mubr.msk.f32.gmra.mxu0 %vm239_vm1, %v5465_v16  ;;  %v7138_v16 = vld [vmem:[#allocation28_spill] sm:$0xff] }
  0xd5   : > { %v6231_v6 = vpop.f32.mrf.mxu1  ;;  %5148 = vmatmul.mubr.msk.f32.gmra.mxu1 %vm239_vm1, %v7135_v51  ;;  %5200 = vmatprep.mubr.msk.f32.mxu0 %vm239_vm1, %v5472_v18 }
  0xd6   : > { %5150 = vmatprep.mubr.msk.f32.mxu1 %vm239_vm1, %v7136_v8  ;;  %v6241_v12 = vpop.f32.mrf.mxu0 }
  0xd7   : > { %v6243_v53 = vpop.f32.mrf.mxu1 }
  0xd8   : > { %v6245_v14 = vpop.f32.mrf.mxu0  ;;  %5201 = vmatmul.mubr.msk.f32.gmra.mxu0 %vm239_vm1, %v5491_v20  ;;  %v7140_v20 = vld [vmem:[#allocation30_spill] sm:$0xff] }
  0xd9   : > { %v6247_v54 = vpop.f32.mrf.mxu1  ;;  %5151 = vmatmul.mubr.msk.f32.gmra.mxu1 %vm239_vm1, %v7137_v55  ;;  %5203 = vmatprep.mubr.msk.f32.mxu0 %vm239_vm1, %v5497_v22 }
  0xda   : > { %5153 = vmatprep.mubr.msk.f32.mxu1 %vm239_vm1, %v7138_v16  ;;  %v6257_v18 = vpop.f32.mrf.mxu0  ;;  %v566_v16 = vadd.f32 %v6229_v4, %v6351_v49 }
  0xdb   : > { %v6259_v56 = vpop.f32.mrf.mxu1 }
  0xdc   : > { %v6261_v57 = vpop.f32.mrf.mxu0  ;;  %5204 = vmatmul.mubr.msk.f32.gmra.mxu0 %vm239_vm1, %v5535_v29 }
  0xdd   : > { %v6263_v58 = vpop.f32.mrf.mxu1  ;;  %5154 = vmatmul.mubr.msk.f32.gmra.mxu1 %vm239_vm1, %v7139_v61  ;;  %5206 = vmatprep.mubr.msk.f32.mxu0 %vm239_vm1, %v5550_v32 }
  0xde   : > { %5156 = vmatprep.mubr.msk.f32.mxu1 %vm239_vm1, %v7140_v20  ;;  %v6273_v22 = vpop.f32.mrf.mxu0 }
  0xdf   : > { %v6275_v63 = vpop.f32.mrf.mxu1 }
  0xe0   : > { %v6277_v0 = vpop.f32.mrf.mxu0  ;;  %5207 = vmatmul.mubr.msk.f32.gmra.mxu0 %vm239_vm1, %v7113_v7 }
  0xe1   : > { %v6279_v1 = vpop.f32.mrf.mxu1  ;;  %5157 = vmatmul.mubr.msk.f32.gmra.mxu1 %vm239_vm1, %v7141_v2  ;;  %5209 = vmatprep.mubr.msk.f32.mxu0 %vm239_vm1, %v7114_v11 }
  0xe2   : > { %5159 = vmatprep.mubr.msk.f32.mxu1 %vm239_vm1, %v5960_v10  ;;  %v6289_v29 = vpop.f32.mrf.mxu0 }
  0xe3   : > { %v6291_v32 = vpop.f32.mrf.mxu1 }
  0xe4   : > { %v6293_v3 = vpop.f32.mrf.mxu0  ;;  %5210 = vmatmul.mubr.msk.f32.gmra.mxu0 %vm239_vm1, %v7115_v23 }
  0xe5   : > { %v6295_v60 = vpop.f32.mrf.mxu1  ;;  %5160 = vmatmul.mubr.msk.f32.gmra.mxu1 %vm239_vm1, %v7142_v52  ;;  %5212 = vmatprep.mubr.msk.f32.mxu0 %vm239_vm1, %v7116_v24  ;;  %v568_v52 = vadd.f32 %v6245_v14, %v6351_v49 }
  0xe6   : > { %5162 = vmatprep.mubr.msk.f32.mxu1 %vm239_vm1, %v5974_v5  ;;  %v6305_v10 = vpop.f32.mrf.mxu0  ;;  %v7143_v5 = vld [vmem:[#allocation33_spill] sm:$0xff] }
  0xe7   : > { %v6307_v7 = vpop.f32.mrf.mxu1 }
  0xe8   : > { %v6309_v11 = vpop.f32.mrf.mxu0  ;;  %5213 = vmatmul.mubr.msk.f32.gmra.mxu0 %vm239_vm1, %v7117_v41  ;;  %v4404_v41 = vld [vmem:[%s5399_s27 + $0x1a0] sm:$0xff] }
  0xe9   : > { %v6311_v43 = vpop.f32.mrf.mxu1  ;;  %5163 = vmatmul.mubr.msk.f32.gmra.mxu1 %vm239_vm1, %v5985_v9  ;;  %5215 = vmatprep.mubr.msk.f32.mxu0 %vm239_vm1, %v6140_v39  ;;  %v7144_v9 = vld [vmem:[#allocation34_spill] sm:$0xff]  ;;  %v6341_v39 = vld [vmem:[%s5399_s27 + $0x18a] sm:$0xff] }
  0xea   : > { %5165 = vmatprep.mubr.msk.f32.mxu1 %vm239_vm1, %v7143_v5  ;;  %v6321_v23 = vpop.f32.mrf.mxu0 }
  0xeb   : > { %v6323_v24 = vpop.f32.mrf.mxu1 }
  0xec   : > { %v6329_v30 = vpop.f32.mrf.mxu0  ;;  %5216 = vmatmul.mubr.msk.f32.gmra.mxu0 %vm239_vm1, %v6151_v42 }
  0xed   : > { %v6331_v36 = vpop.f32.mrf.mxu1  ;;  %5166 = vmatmul.mubr.msk.f32.gmra.mxu1 %vm239_vm1, %v7144_v9  ;;  %5218 = vmatprep.mubr.msk.f32.mxu0 %vm239_vm1, %v4403_v26 }
  0xee   : > { %5168 = vmatprep.mubr.msk.f32.mxu1 %vm239_vm1, %v6326_v44  ;;  %v6344_v40 = vpop.f32.mrf.mxu0 }
  0xef   : > { %v6346_v46 = vpop.f32.mrf.mxu1 }
  0xf0   : > { %v6353_v50 = vpop.f32.mrf.mxu0  ;;  %5219 = vmatmul.mubr.msk.f32.gmra.mxu0 %vm239_vm1, %v4404_v41 }
  0xf1   : > { %v4920_v42 = vpop.f32.mrf.mxu1  ;;  %5169 = vmatmul.mubr.msk.f32.gmra.mxu1 %vm239_vm1, %v6341_v39  ;;  %5273 = vmatprep.mubr.msk.f32.mxu0 %vm239_vm1, %v7120_v45 }
  0xf2   : > { %v6359_v51 = vadd.f32 %v4920_v42, %v6351_v49  ;;  %5223 = vmatprep.mubr.msk.f32.mxu1 %vm239_vm1, %v5506_v25  ;;  %v6365_v8 = vpop.f32.mrf.mxu0  ;;  %v565_v25 = vadd.f32 %v6351_v49, %v6241_v12 }
  0xf3   : > { %v6367_v55 = vpop.f32.mrf.mxu1 }
  0xf4   : > { %v4975_v20 = vpop.f32.mrf.mxu0  ;;  %5274 = vmatmul.mubr.msk.f32.vlgmr.msra.gmra.mxu0 %vm239_vm1, %v7121_v47 }
  0xf5   : > { %v4925_v61 = vpop.f32.mrf.mxu1  ;;  %5224 = vmatmul.mubr.msk.f32.vlgmr.msra.gmra.mxu1 %vm239_vm1, %v5522_v27  ;;  %5276 = vmatprep.mubr.msk.f32.mxu0 %vm239_vm1, %v7122_v13 }
  0xf6   : > { %v956_v2 = vadd.f32 %v4925_v61, %v566_v16  ;;  %5226 = vmatprep.mubr.msk.f32.mxu1 %vm239_vm1, %v5525_v28  ;;  %v1186_v4 = vpop.f32.mrf.mxu0  ;;  %v567_v28 = vadd.f32 %v6351_v49, %v6257_v18 }
  0xf7   : > { %v796_v45 = vpop.f32.mrf.mxu1 }
  0xf8   : > { %v6383_v5 = vadd.f32 %v4975_v20, %v956_v2  ;;  %v955_v27 = vadd.f32 %v796_v45, %v565_v25  ;;  %v4978_v47 = vpop.f32.mrf.mxu0  ;;  %5277 = vmatmul.mubr.msk.f32.gmra.mxu0 %vm239_vm1, %v7123_v15 }
  0xf9   : > { %v4928_v26 = vpop.f32.mrf.mxu1  ;;  %5227 = vmatmul.mubr.msk.f32.gmra.mxu1 %vm239_vm1, %v5541_v31  ;;  %5279 = vmatprep.mubr.msk.f32.mxu0 %vm239_vm1, %v7124_v48  ;;  %v570_v31 = vadd.f32 %v6261_v57, %v6351_v49 }
  0xfa   : > { %v6391_v13 = vadd.f32 %v1186_v4, %v955_v27  ;;  %v958_v12 = vadd.f32 %v4928_v26, %v568_v52  ;;  %5229 = vmatprep.mubr.msk.f32.mxu1 %vm239_vm1, %v5553_v33  ;;  %v1196_v9 = vpop.f32.mrf.mxu0  ;;  %v569_v33 = vadd.f32 %v6351_v49, %v6273_v22  ;;  %v4514_v4 = vld [vmem:[%s5399_s27 + $0x9a] sm:$0xff]  ;;  %v4515_v26 = vld [vmem:[%s5399_s27 + $0xaa] sm:$0xff] }
  0xfb   : > { %v806_v14 = vpop.f32.mrf.mxu1 }
  0xfc   : > { %v6399_v41 = vadd.f32 %v4978_v47, %v958_v12  ;;  %v957_v15 = vadd.f32 %v806_v14, %v567_v28  ;;  %v4981_v18 = vpop.f32.mrf.mxu0  ;;  %5280 = vmatmul.mubr.msk.f32.gmra.mxu0 %vm239_vm1, %v7125_v17  ;;  %v572_v17 = vadd.f32 %v6277_v0, %v6351_v49  ;;  %v4448_v0 = vld [vmem:[%s5399_s27 + $0x99] sm:$0xff]  ;;  %v573_v12 = vadd.f32 %v6351_v49, %v6305_v10 }
  0xfd   : > { %v4931_v42 = vpop.f32.mrf.mxu1  ;;  %5230 = vmatmul.mubr.msk.f32.gmra.mxu1 %vm239_vm1, %v5556_v34  ;;  %5282 = vmatprep.mubr.msk.f32.mxu0 %vm239_vm1, %v7126_v19  ;;  %v4513_v34 = vld [vmem:[%s5399_s27 + $0x92] sm:$0xff] }
  0xfe   : > { %v6407_v48 = vadd.f32 %v1196_v9, %v957_v15  ;;  %v960_v16 = vadd.f32 %v4931_v42, %v570_v31  ;;  %5232 = vmatprep.mubr.msk.f32.mxu1 %vm239_vm1, %v5562_v35  ;;  %v1206_v61 = vpop.f32.mrf.mxu0  ;;  %v571_v35 = vadd.f32 %v6351_v49, %v6289_v29  ;;  %v4516_v31 = vld [vmem:[%s5399_s27 + $0xb2] sm:$0xff] }
  0xff   : > { %v816_v57 = vpop.f32.mrf.mxu1 }
 0x100   : > { %v6416_v20 = vadd.f32 %v4981_v18, %v960_v16  ;;  %v959_v22 = vadd.f32 %v816_v57, %v569_v33  ;;  %v4984_v2 = vpop.f32.mrf.mxu0  ;;  %5283 = vmatmul.mubr.msk.f32.gmra.mxu0 %vm239_vm1, %v7127_v21  ;;  %v574_v21 = vadd.f32 %v6293_v3, %v6351_v49  ;;  %v4450_v3 = vld [vmem:[%s5399_s27 + $0xb1] sm:$0xff]  ;;  %v4451_v18 = vld [vmem:[%s5399_s27 + $0xc1] sm:$0xff]  ;;  %v576_v16 = vadd.f32 %v6309_v11, %v6351_v49  ;;  %v4452_v11 = vld [vmem:[%s5399_s27 + $0xc9] sm:$0xff] }
 0x101   : > { %v4934_v25 = vpop.f32.mrf.mxu1  ;;  %5233 = vmatmul.mubr.msk.f32.gmra.mxu1 %vm239_vm1, %v5578_v37  ;;  %5285 = vmatprep.mubr.msk.f32.mxu0 %vm239_vm1, %v4513_v34  ;;  %v4449_v37 = vld [vmem:[%s5399_s27 + $0xa9] sm:$0xff] }
 0x102   : > { %v6424_v19 = vadd.f32 %v1206_v61, %v959_v22  ;;  %v962_v45 = vadd.f32 %v4934_v25, %v572_v17  ;;  %5235 = vmatprep.mubr.msk.f32.mxu1 %vm239_vm1, %v5581_v38  ;;  %v1216_v27 = vpop.f32.mrf.mxu0  ;;  %v4517_v33 = vld [vmem:[%s5399_s27 + $0xc2] sm:$0xff]  ;;  %v575_v17 = vadd.f32 %v6351_v49, %v6321_v23 }
 0x103   : > { %v826_v52 = vpop.f32.mrf.mxu1 }
 0x104   : > { %v6435_v29 = vadd.f32 %v4984_v2, %v962_v45  ;;  %v961_v47 = vadd.f32 %v826_v52, %v571_v35  ;;  %v4987_v38 = vpop.f32.mrf.mxu0  ;;  %5286 = vmatmul.mubr.msk.f32.gmra.mxu0 %vm239_vm1, %v4514_v4  ;;  %v4518_v2 = vld [vmem:[%s5399_s27 + $0xca] sm:$0xff]  ;;  %v4519_v4 = vld [vmem:[%s5399_s27 + $0xda] sm:$0xff]  ;;  %v578_v52 = vadd.f32 %v6329_v30, %v6351_v49 }
 0x105   : > { %v4937_v28 = vpop.f32.mrf.mxu1  ;;  %5236 = vmatmul.mubr.msk.f32.gmra.mxu1 %vm239_vm1, %v4448_v0  ;;  %5288 = vmatprep.mubr.msk.f32.mxu0 %vm239_vm1, %v4515_v26  ;;  %v4453_v0 = vld [vmem:[%s5399_s27 + $0xd9] sm:$0xff]  ;;  %v4454_v30 = vld [vmem:[%s5399_s27 + $0xe1] sm:$0xff] }
 0x106   : > { %v6441_v14 = vadd.f32 %v1216_v27, %v961_v47  ;;  %v964_v9 = vadd.f32 %v4937_v28, %v574_v21  ;;  %5238 = vmatprep.mubr.msk.f32.mxu1 %vm239_vm1, %v4449_v37  ;;  %v1226_v42 = vpop.f32.mrf.mxu0  ;;  %v577_v21 = vadd.f32 %v6351_v49, %v6344_v40 }
 0x107   : > { %v836_v15 = vpop.f32.mrf.mxu1 }
 0x108   : > { %v6451_v10 = vadd.f32 %v4987_v38, %v964_v9  ;;  %v963_v57 = vadd.f32 %v836_v15, %v573_v12  ;;  %v4990_v34 = vpop.f32.mrf.mxu0  ;;  %5289 = vmatmul.mubr.msk.f32.gmra.mxu0 %vm239_vm1, %v4516_v31  ;;  %v4520_v38 = vld [vmem:[%s5399_s27 + $0xe2] sm:$0xff]  ;;  %v4521_v31 = vld [vmem:[%s5399_s27 + $0xf2] sm:$0xff]  ;;  %v580_v15 = vadd.f32 %v6353_v50, %v6351_v49 }
 0x109   : > { %v4940_v61 = vpop.f32.mrf.mxu1  ;;  %5239 = vmatmul.mubr.msk.f32.gmra.mxu1 %vm239_vm1, %v4450_v3  ;;  %5291 = vmatprep.mubr.msk.f32.mxu0 %vm239_vm1, %v4517_v33  ;;  %v4455_v3 = vld [vmem:[%s5399_s27 + $0xf1] sm:$0xff]  ;;  %v4456_v50 = vld [vmem:[%s5399_s27 + $0xf9] sm:$0xff] }
 0x10a   : > { %v6457_v22 = vadd.f32 %v1226_v42, %v963_v57  ;;  %v966_v25 = vadd.f32 %v4940_v61, %v576_v16  ;;  %5241 = vmatprep.mubr.msk.f32.mxu1 %vm239_vm1, %v4451_v18  ;;  %v1236_v45 = vpop.f32.mrf.mxu0  ;;  %v579_v16 = vadd.f32 %v6351_v49, %v6365_v8 }
 0x10b   : > { %v846_v35 = vpop.f32.mrf.mxu1 }
 0x10c   : > { %v6467_v23 = vadd.f32 %v4990_v34, %v966_v25  ;;  %v965_v27 = vadd.f32 %v846_v35, %v575_v17  ;;  %v4993_v26 = vpop.f32.mrf.mxu0  ;;  %5292 = vmatmul.mubr.msk.f32.gmra.mxu0 %vm239_vm1, %v4518_v2  ;;  %v4522_v34 = vld [vmem:[%s5399_s27 + $0xfa] sm:$0xff]  ;;  %v4523_v2 = vld [vmem:[%s5399_s27 + $0x10a] sm:$0xff]  ;;  %v582_v35 = vadd.f32 %v6231_v6, %v6351_v49 }
 0x10d   : > { %v4943_v37 = vpop.f32.mrf.mxu1  ;;  %5242 = vmatmul.mubr.msk.f32.gmra.mxu1 %vm239_vm1, %v4452_v11  ;;  %5294 = vmatprep.mubr.msk.f32.mxu0 %vm239_vm1, %v4519_v4  ;;  %v4457_v11 = vld [vmem:[%s5399_s27 + $0x109] sm:$0xff]  ;;  %v4458_v6 = vld [vmem:[%s5399_s27 + $0x111] sm:$0xff] }
 0x10e   : > { %v6473_v47 = vadd.f32 %v1236_v45, %v965_v27  ;;  %v968_v28 = vadd.f32 %v4943_v37, %v578_v52  ;;  %5244 = vmatprep.mubr.msk.f32.mxu1 %vm239_vm1, %v4453_v0  ;;  %v1246_v9 = vpop.f32.mrf.mxu0  ;;  %v581_v52 = vadd.f32 %v6351_v49, %v6243_v53 }
 0x10f   : > { %v856_v12 = vpop.f32.mrf.mxu1 }
 0x110   : > { %v6483_v40 = vadd.f32 %v4993_v26, %v968_v28  ;;  %v967_v42 = vadd.f32 %v856_v12, %v577_v21  ;;  %v4996_v33 = vpop.f32.mrf.mxu0  ;;  %5295 = vmatmul.mubr.msk.f32.gmra.mxu0 %vm239_vm1, %v4520_v38  ;;  %v4524_v26 = vld [vmem:[%s5399_s27 + $0x112] sm:$0xff]  ;;  %v4525_v38 = vld [vmem:[%s5399_s27 + $0x122] sm:$0xff]  ;;  %v584_v12 = vadd.f32 %v6247_v54, %v6351_v49 }
 0x111   : > { %v4946_v18 = vpop.f32.mrf.mxu1  ;;  %5245 = vmatmul.mubr.msk.f32.gmra.mxu1 %vm239_vm1, %v4454_v30  ;;  %5297 = vmatprep.mubr.msk.f32.mxu0 %vm239_vm1, %v4521_v31  ;;  %v4459_v30 = vld [vmem:[%s5399_s27 + $0x121] sm:$0xff]  ;;  %v4460_v54 = vld [vmem:[%s5399_s27 + $0x129] sm:$0xff] }
 0x112   : > { %v6489_v57 = vadd.f32 %v1246_v9, %v967_v42  ;;  %v970_v61 = vadd.f32 %v4946_v18, %v580_v15  ;;  %5247 = vmatprep.mubr.msk.f32.mxu1 %vm239_vm1, %v4455_v3  ;;  %v1256_v25 = vpop.f32.mrf.mxu0  ;;  %v583_v15 = vadd.f32 %v6351_v49, %v6259_v56 }
 0x113   : > { %v866_v17 = vpop.f32.mrf.mxu1 }
 0x114   : > { %v6499_v8 = vadd.f32 %v4996_v33, %v970_v61  ;;  %v969_v45 = vadd.f32 %v866_v17, %v579_v16  ;;  %v4999_v4 = vpop.f32.mrf.mxu0  ;;  %5298 = vmatmul.mubr.msk.f32.gmra.mxu0 %vm239_vm1, %v4522_v34  ;;  %v4526_v33 = vld [vmem:[%s5399_s27 + $0x12a] sm:$0xff]  ;;  %v4527_v34 = vld [vmem:[%s5399_s27 + $0x13a] sm:$0xff]  ;;  %v586_v17 = vadd.f32 %v6263_v58, %v6351_v49 }
 0x115   : > { %v4949_v0 = vpop.f32.mrf.mxu1  ;;  %5248 = vmatmul.mubr.msk.f32.gmra.mxu1 %vm239_vm1, %v4456_v50  ;;  %5300 = vmatprep.mubr.msk.f32.mxu0 %vm239_vm1, %v4523_v2  ;;  %v4461_v50 = vld [vmem:[%s5399_s27 + $0x139] sm:$0xff]  ;;  %v4462_v58 = vld [vmem:[%s5399_s27 + $0x141] sm:$0xff] }
 0x116   : > { %v6505_v27 = vadd.f32 %v1256_v25, %v969_v45  ;;  %v972_v37 = vadd.f32 %v4949_v0, %v582_v35  ;;  %5250 = vmatprep.mubr.msk.f32.mxu1 %vm239_vm1, %v4457_v11  ;;  %v1266_v28 = vpop.f32.mrf.mxu0  ;;  %v585_v35 = vadd.f32 %v6351_v49, %v6275_v63 }
 0x117   : > { %v876_v21 = vpop.f32.mrf.mxu1 }
 0x118   : > { %v6515_v53 = vadd.f32 %v4999_v4, %v972_v37  ;;  %v971_v9 = vadd.f32 %v876_v21, %v581_v52  ;;  %v5002_v31 = vpop.f32.mrf.mxu0  ;;  %5301 = vmatmul.mubr.msk.f32.gmra.mxu0 %vm239_vm1, %v4524_v26  ;;  %v4528_v4 = vld [vmem:[%s5399_s27 + $0x142] sm:$0xff]  ;;  %v4529_v26 = vld [vmem:[%s5399_s27 + $0x152] sm:$0xff]  ;;  %v588_v21 = vadd.f32 %v6279_v1, %v6351_v49 }
 0x119   : > { %v4952_v3 = vpop.f32.mrf.mxu1  ;;  %5251 = vmatmul.mubr.msk.f32.gmra.mxu1 %vm239_vm1, %v4458_v6  ;;  %5303 = vmatprep.mubr.msk.f32.mxu0 %vm239_vm1, %v4525_v38  ;;  %v4463_v6 = vld [vmem:[%s5399_s27 + $0x151] sm:$0xff]  ;;  %v4464_v1 = vld [vmem:[%s5399_s27 + $0x159] sm:$0xff] }
 0x11a   : > { %v6521_v42 = vadd.f32 %v1266_v28, %v971_v9  ;;  %v974_v18 = vadd.f32 %v4952_v3, %v584_v12  ;;  %5253 = vmatprep.mubr.msk.f32.mxu1 %vm239_vm1, %v4459_v30  ;;  %v1276_v61 = vpop.f32.mrf.mxu0  ;;  %v587_v12 = vadd.f32 %v6351_v49, %v6291_v32 }
 0x11b   : > { %v886_v16 = vpop.f32.mrf.mxu1 }
 0x11c   : > { %v6531_v56 = vadd.f32 %v5002_v31, %v974_v18  ;;  %v973_v25 = vadd.f32 %v886_v16, %v583_v15  ;;  %v5005_v2 = vpop.f32.mrf.mxu0  ;;  %5304 = vmatmul.mubr.msk.f32.gmra.mxu0 %vm239_vm1, %v4526_v33  ;;  %v4530_v31 = vld [vmem:[%s5399_s27 + $0x15a] sm:$0xff]  ;;  %v4531_v33 = vld [vmem:[%s5399_s27 + $0x16a] sm:$0xff]  ;;  %v590_v16 = vadd.f32 %v6295_v60, %v6351_v49  ;;  %v4532_v60 = vld [vmem:[%s5399_s27 + $0x172] sm:$0xff] }
 0x11d   : > { %v4955_v11 = vpop.f32.mrf.mxu1  ;;  %5254 = vmatmul.mubr.msk.f32.gmra.mxu1 %vm239_vm1, %v4460_v54  ;;  %5306 = vmatprep.mubr.msk.f32.mxu0 %vm239_vm1, %v4527_v34  ;;  %v4465_v54 = vld [vmem:[%s5399_s27 + $0x169] sm:$0xff] }
 0x11e   : > { %v6537_v45 = vadd.f32 %v1276_v61, %v973_v25  ;;  %v976_v0 = vadd.f32 %v4955_v11, %v586_v17  ;;  %5256 = vmatprep.mubr.msk.f32.mxu1 %vm239_vm1, %v4461_v50  ;;  %v1286_v37 = vpop.f32.mrf.mxu0  ;;  %v589_v17 = vadd.f32 %v6351_v49, %v6307_v7 }
 0x11f   : > { %v896_v52 = vpop.f32.mrf.mxu1 }
 0x120   : > { %v6547_v63 = vadd.f32 %v5005_v2, %v976_v0  ;;  %v975_v28 = vadd.f32 %v896_v52, %v585_v35  ;;  %v5008_v38 = vpop.f32.mrf.mxu0  ;;  %5307 = vmatmul.mubr.msk.f32.gmra.mxu0 %vm239_vm1, %v4528_v4  ;;  %v4466_v2 = vld [vmem:[%s5399_s27 + $0x171] sm:$0xff] }
 0x121   : > { %v4958_v30 = vpop.f32.mrf.mxu1  ;;  %5257 = vmatmul.mubr.msk.f32.gmra.mxu1 %vm239_vm1, %v4462_v58  ;;  %5309 = vmatprep.mubr.msk.f32.mxu0 %vm239_vm1, %v4529_v26  ;;  %v592_v58 = vadd.f32 %v6311_v43, %v6351_v49 }
 0x122   : > { %v6553_v9 = vadd.f32 %v1286_v37, %v975_v28  ;;  %v978_v3 = vadd.f32 %v4958_v30, %v588_v21  ;;  %5259 = vmatprep.mubr.msk.f32.mxu1 %vm239_vm1, %v4463_v6  ;;  %v1296_v18 = vpop.f32.mrf.mxu0  ;;  %v591_v6 = vadd.f32 %v6351_v49, %v6323_v24  ;;  %v4469_v30 = vld [vmem:[%s5399_s27 + $0x199] sm:$0xff] }
 0x123   : > { %v906_v15 = vpop.f32.mrf.mxu1 }
 0x124   : > { %v6563_v61 = vadd.f32 %v5008_v38, %v978_v3  ;;  %v977_v32 = vadd.f32 %v906_v15, %v587_v12  ;;  %v5011_v34 = vpop.f32.mrf.mxu0  ;;  %5310 = vmatmul.mubr.msk.f32.gmra.mxu0 %vm239_vm1, %v4530_v31  ;;  %v4535_v38 = vld [vmem:[%s5399_s27 + $0x19a] sm:$0xff]  ;;  %v594_v12 = vadd.f32 %v6331_v36, %v6351_v49 }
 0x125   : > { %v4961_v50 = vpop.f32.mrf.mxu1  ;;  %5260 = vmatmul.mubr.msk.f32.gmra.mxu1 %vm239_vm1, %v4464_v1  ;;  %5312 = vmatprep.mubr.msk.f32.mxu0 %vm239_vm1, %v4531_v33  ;;  %v4470_v36 = vld [vmem:[%s5399_s27 + $0x1a1] sm:$0xff] }
 0x126   : > { %v6569_v25 = vadd.f32 %v1296_v18, %v977_v32  ;;  %v980_v11 = vadd.f32 %v4961_v50, %v590_v16  ;;  %5262 = vmatprep.mubr.msk.f32.mxu1 %vm239_vm1, %v4465_v54  ;;  %v1306_v0 = vpop.f32.mrf.mxu0  ;;  %v4536_v18 = vld [vmem:[%s5399_s27 + $0x1a2] sm:$0xff] }
 0x127   : > { %v916_v35 = vpop.f32.mrf.mxu1 }
 0x128   : > { %v6577_v4 = vadd.f32 %v5011_v34, %v980_v11  ;;  %v979_v52 = vadd.f32 %v916_v35, %v589_v17  ;;  %v5014_v37 = vpop.f32.mrf.mxu0  ;;  %5313 = vmatmul.mubr.msk.f32.gmra.mxu0 %vm239_vm1, %v4532_v60 }
 0x129   : > { %v4964_v7 = vpop.f32.mrf.mxu1  ;;  %5263 = vmatmul.mubr.msk.f32.gmra.mxu1 %vm239_vm1, %v4466_v2  ;;  %5315 = vmatprep.mubr.msk.f32.mxu0 %vm239_vm1, %v6326_v44 }
 0x12a   : > { %v6583_v26 = vadd.f32 %v1306_v0, %v979_v52  ;;  %v982_v21 = vadd.f32 %v4964_v7, %v592_v58  ;;  %5265 = vmatprep.mubr.msk.f32.mxu1 %vm239_vm1, %v5764_v59  ;;  %v1316_v28 = vpop.f32.mrf.mxu0  ;;  %v593_v59 = vadd.f32 %v6351_v49, %v6346_v46 }
 0x12b   : > { %v926_v43 = vpop.f32.mrf.mxu1 }
 0x12c   : > { %v6593_v3 = vadd.f32 %v5014_v37, %v982_v21  ;;  %v981_v24 = vadd.f32 %v926_v43, %v591_v6  ;;  %v5017_v31 = vpop.f32.mrf.mxu0  ;;  %5316 = vmatmul.mubr.msk.f32.gmra.mxu0 %vm239_vm1, %v6341_v39  ;;  %v595_v39 = vadd.f32 %v6351_v49, %v6367_v55 }
 0x12d   : > { %v4967_v1 = vpop.f32.mrf.mxu1  ;;  %5266 = vmatmul.mubr.msk.f32.gmra.mxu1 %vm239_vm1, %v5773_v62  ;;  %5318 = vmatprep.mubr.msk.f32.mxu0 %vm239_vm1, %v4535_v38 }
 0x12e   : > { %v6601_v44 = vadd.f32 %v1316_v28, %v981_v24  ;;  %v984_v15 = vadd.f32 %v4967_v1, %v594_v12  ;;  %5268 = vmatprep.mubr.msk.f32.mxu1 %vm239_vm1, %v4469_v30  ;;  %v1326_v33 = vpop.f32.mrf.mxu0 }
 0x12f   : > { %v936_v54 = vpop.f32.mrf.mxu1 }
 0x130   : > { %v6607_v16 = vadd.f32 %v5017_v31, %v984_v15  ;;  %v983_v62 = vadd.f32 %v936_v54, %v593_v59  ;;  %v5020_v50 = vpop.f32.mrf.mxu0  ;;  %5319 = vmatmul.mubr.msk.f32.gmra.mxu0 %vm239_vm1, %v4536_v18 }
 0x131   : > { %v4970_v32 = vpop.f32.mrf.mxu1  ;;  %5269 = vmatmul.mubr.msk.f32.gmra.mxu1 %vm239_vm1, %v4470_v36 }
 0x132   : > { %v6613_v46 = vadd.f32 %v1326_v33, %v983_v62  ;;  %v986_v34 = vadd.f32 %v4970_v32, %v6359_v51  ;;  %v1336_v11 = vpop.f32.mrf.mxu0 }
 0x133   : > { %v946_v17 = vpop.f32.mrf.mxu1 }
 0x134   : > { %v6616_v2 = vadd.f32 %v5020_v50, %v986_v34  ;;  %v985_v60 = vadd.f32 %v946_v17, %v595_v39  ;;  %v5075_v0 = vpop.f32.mrf.mxu0 }
 0x135   : > { %v5025_v35 = vpop.f32.mrf.mxu1 }
 0x136   : > { %v6618_v58 = vadd.f32 %v1336_v11, %v985_v60  ;;  %v1737_v52 = vadd.f32 %v5025_v35, %v6383_v5  ;;  %v1999_v37 = vpop.f32.mrf.mxu0 }
 0x137   : > { %v1577_v7 = vpop.f32.mrf.mxu1 }
 0x138   : > { %v6621_v6 = vadd.f32 %v5075_v0, %v1737_v52  ;;  %v1736_v49 = vadd.f32 %v1577_v7, %v6391_v13  ;;  %v5078_v21 = vpop.f32.mrf.mxu0 }
 0x139   : > { %v5028_v55 = vpop.f32.mrf.mxu1 }
 0x13a   : > { %v6624_v51 = vadd.f32 %v1999_v37, %v1736_v49  ;;  %v1739_v43 = vadd.f32 %v5028_v55, %v6399_v41  ;;  %v2009_v30 = vpop.f32.mrf.mxu0 }
 0x13b   : > { %v1587_v28 = vpop.f32.mrf.mxu1 }
 0x13c   : > { %v6627_v38 = vadd.f32 %v5078_v21, %v1739_v43  ;;  %v1738_v12 = vadd.f32 %v1587_v28, %v6407_v48  ;;  %v5081_v5 = vpop.f32.mrf.mxu0 }
 0x13d   : > { %v5031_v24 = vpop.f32.mrf.mxu1 }
 0x13e   : > { %v6630_v1 = vadd.f32 %v2009_v30, %v1738_v12  ;;  %v1741_v31 = vadd.f32 %v5031_v24, %v6416_v20  ;;  %v2019_v13 = vpop.f32.mrf.mxu0 }
 0x13f   : > { %v1597_v59 = vpop.f32.mrf.mxu1 }
 0x140   : > { %v6633_v15 = vadd.f32 %v5081_v5, %v1741_v31  ;;  %v1740_v36 = vadd.f32 %v1597_v59, %v6424_v19  ;;  %v5084_v41 = vpop.f32.mrf.mxu0 }
 0x141   : > { %v5034_v18 = vpop.f32.mrf.mxu1 }
 0x142   : > { %v6636_v54 = vadd.f32 %v2019_v13, %v1740_v36  ;;  %v1743_v33 = vadd.f32 %v5034_v18, %v6435_v29  ;;  %v2029_v48 = vpop.f32.mrf.mxu0 }
 0x143   : > { %v1607_v62 = vpop.f32.mrf.mxu1 }
 0x144   : > { %v6639_v32 = vadd.f32 %v5084_v41, %v1743_v33  ;;  %v1742_v50 = vadd.f32 %v1607_v62, %v6441_v14  ;;  %v5087_v20 = vpop.f32.mrf.mxu0 }
 0x145   : > { %v5037_v39 = vpop.f32.mrf.mxu1 }
 0x146   : > { %v6642_v34 = vadd.f32 %v2029_v48, %v1742_v50  ;;  %v1745_v17 = vadd.f32 %v5037_v39, %v6451_v10  ;;  %v2039_v19 = vpop.f32.mrf.mxu0 }
 0x147   : > { %v1617_v11 = vpop.f32.mrf.mxu1 }
 0x148   : > { %v6645_v60 = vadd.f32 %v5087_v20, %v1745_v17  ;;  %v1744_v35 = vadd.f32 %v1617_v11, %v6457_v22  ;;  %v5090_v29 = vpop.f32.mrf.mxu0 }
 0x149   : > { %v5040_v0 = vpop.f32.mrf.mxu1 }
 0x14a   : > { %v6648_v52 = vadd.f32 %v2039_v19, %v1744_v35  ;;  %v1747_v7 = vadd.f32 %v5040_v0, %v6467_v23  ;;  %v2049_v14 = vpop.f32.mrf.mxu0 }
 0x14b   : > { %v1627_v37 = vpop.f32.mrf.mxu1 }
 0x14c   : > { %v6651_v49 = vadd.f32 %v5090_v29, %v1747_v7  ;;  %v1746_v55 = vadd.f32 %v1627_v37, %v6473_v47  ;;  %v5093_v10 = vpop.f32.mrf.mxu0 }
 0x14d   : > { %v5043_v21 = vpop.f32.mrf.mxu1 }
 0x14e   : > { %v6654_v43 = vadd.f32 %v2049_v14, %v1746_v55  ;;  %v1749_v28 = vadd.f32 %v5043_v21, %v6483_v40  ;;  %v2059_v22 = vpop.f32.mrf.mxu0 }
 0x14f   : > { %v1637_v30 = vpop.f32.mrf.mxu1 }
 0x150   : > { %v6657_v12 = vadd.f32 %v5093_v10, %v1749_v28  ;;  %v1748_v24 = vadd.f32 %v1637_v30, %v6489_v57  ;;  %v5096_v23 = vpop.f32.mrf.mxu0 }
 0x151   : > { %v5046_v5 = vpop.f32.mrf.mxu1 }
 0x152   : > { %v6660_v31 = vadd.f32 %v2059_v22, %v1748_v24  ;;  %v1751_v59 = vadd.f32 %v5046_v5, %v6499_v8  ;;  %v2069_v47 = vpop.f32.mrf.mxu0 }
 0x153   : > { %v1647_v13 = vpop.f32.mrf.mxu1 }
 0x154   : > { %v6663_v36 = vadd.f32 %v5096_v23, %v1751_v59  ;;  %v1750_v18 = vadd.f32 %v1647_v13, %v6505_v27  ;;  %v5099_v40 = vpop.f32.mrf.mxu0 }
 0x155   : > { %v5049_v41 = vpop.f32.mrf.mxu1 }
 0x156   : > { %v6666_v33 = vadd.f32 %v2069_v47, %v1750_v18  ;;  %v1753_v62 = vadd.f32 %v5049_v41, %v6515_v53  ;;  %v2079_v57 = vpop.f32.mrf.mxu0 }
 0x157   : > { %v1657_v48 = vpop.f32.mrf.mxu1 }
 0x158   : > { %v6669_v50 = vadd.f32 %v5099_v40, %v1753_v62  ;;  %v1752_v39 = vadd.f32 %v1657_v48, %v6521_v42  ;;  %v5102_v8 = vpop.f32.mrf.mxu0 }
 0x159   : > { %v5052_v20 = vpop.f32.mrf.mxu1 }
 0x15a   : > { %v6672_v17 = vadd.f32 %v2079_v57, %v1752_v39  ;;  %v1755_v11 = vadd.f32 %v5052_v20, %v6531_v56  ;;  %v2089_v27 = vpop.f32.mrf.mxu0 }
 0x15b   : > { %v1667_v19 = vpop.f32.mrf.mxu1 }
 0x15c   : > { %v6675_v35 = vadd.f32 %v5102_v8, %v1755_v11  ;;  %v1754_v0 = vadd.f32 %v1667_v19, %v6537_v45  ;;  %v5105_v53 = vpop.f32.mrf.mxu0 }
 0x15d   : > { %v5055_v29 = vpop.f32.mrf.mxu1 }
 0x15e   : > { %v6678_v7 = vadd.f32 %v2089_v27, %v1754_v0  ;;  %v1757_v37 = vadd.f32 %v5055_v29, %v6547_v63  ;;  %v2099_v42 = vpop.f32.mrf.mxu0 }
 0x15f   : > { %v1677_v14 = vpop.f32.mrf.mxu1 }
 0x160   : > { %v6681_v55 = vadd.f32 %v5105_v53, %v1757_v37  ;;  %v1756_v21 = vadd.f32 %v1677_v14, %v6553_v9  ;;  %v5108_v56 = vpop.f32.mrf.mxu0 }
 0x161   : > { %v5058_v10 = vpop.f32.mrf.mxu1 }
 0x162   : > { %v6684_v28 = vadd.f32 %v2099_v42, %v1756_v21  ;;  %v1759_v30 = vadd.f32 %v5058_v10, %v6563_v61  ;;  %v2109_v45 = vpop.f32.mrf.mxu0 }
 0x163   : > { %v1687_v22 = vpop.f32.mrf.mxu1 }
 0x164   : > { %v6687_v24 = vadd.f32 %v5108_v56, %v1759_v30  ;;  %v1758_v5 = vadd.f32 %v1687_v22, %v6569_v25  ;;  %v5111_v63 = vpop.f32.mrf.mxu0 }
 0x165   : > { %v5061_v23 = vpop.f32.mrf.mxu1 }
 0x166   : > { %v6690_v59 = vadd.f32 %v2109_v45, %v1758_v5  ;;  %v1761_v13 = vadd.f32 %v5061_v23, %v6577_v4  ;;  %v2119_v9 = vpop.f32.mrf.mxu0 }
 0x167   : > { %v1697_v47 = vpop.f32.mrf.mxu1 }
 0x168   : > { %7145 = vst [vmem:[#allocation3_spill] sm:$0xff] %v6690_v59  ;;  %v6693_v18 = vadd.f32 %v5111_v63, %v1761_v13  ;;  %v1760_v41 = vadd.f32 %v1697_v47, %v6583_v26  ;;  %v5114_v61 = vpop.f32.mrf.mxu0 }
 0x169   : > { %v5064_v40 = vpop.f32.mrf.mxu1 }
 0x16a   : > { %v6696_v62 = vadd.f32 %v2119_v9, %v1760_v41  ;;  %v1763_v48 = vadd.f32 %v5064_v40, %v6593_v3  ;;  %v2129_v25 = vpop.f32.mrf.mxu0 }
 0x16b   : > { %v1707_v57 = vpop.f32.mrf.mxu1 }
 0x16c   : > { %7146 = vst [vmem:[#allocation4_spill] sm:$0xff] %v6696_v62  ;;  %v6699_v39 = vadd.f32 %v5114_v61, %v1763_v48  ;;  %v1762_v20 = vadd.f32 %v1707_v57, %v6601_v44  ;;  %v5117_v4 = vpop.f32.mrf.mxu0 }
 0x16d   : > { %v5067_v8 = vpop.f32.mrf.mxu1 }
 0x16e   : > { %v6702_v11 = vadd.f32 %v2129_v25, %v1762_v20  ;;  %v1765_v19 = vadd.f32 %v5067_v8, %v6607_v16  ;;  %v2139_v26 = vpop.f32.mrf.mxu0 }
 0x16f   : > { %v1717_v27 = vpop.f32.mrf.mxu1 }
 0x170   : > { %7147 = vst [vmem:[#allocation5_spill] sm:$0xff] %v6702_v11  ;;  %v6705_v0 = vadd.f32 %v5117_v4, %v1765_v19  ;;  %v1764_v29 = vadd.f32 %v1717_v27, %v6613_v46  ;;  %v5120_v3 = vpop.f32.mrf.mxu0 }
 0x171   : > { %v5070_v53 = vpop.f32.mrf.mxu1 }
 0x172   : > { %v6708_v37 = vadd.f32 %v2139_v26, %v1764_v29  ;;  %v1767_v14 = vadd.f32 %v5070_v53, %v6616_v2  ;;  %v2149_v44 = vpop.f32.mrf.mxu0 }
 0x173   : > { %v1727_v42 = vpop.f32.mrf.mxu1 }
 0x174   : > { %7148 = vst [vmem:[#allocation6_spill] sm:$0xff] %v6708_v37  ;;  %v6711_v21 = vadd.f32 %v5120_v3, %v1767_v14  ;;  %v1766_v10 = vadd.f32 %v1727_v42, %v6618_v58  ;;  %v6716_v16 = vpop.f32.mrf.mxu0 }
 0x175   : > { %v6714_v56 = vpop.f32.mrf.mxu1 }
 0x176   : > { %v6718_v30 = vadd.f32 %v2149_v44, %v1766_v10  ;;  %v6722_v46 = vpop.f32.mrf.mxu0 }
 0x177   : > { %v6720_v22 = vpop.f32.mrf.mxu1 }
 0x178   : > { %7149 = vst [vmem:[#allocation7_spill] sm:$0xff] %v6718_v30  ;;  %v6726_v5 = vpop.f32.mrf.mxu0 }
 0x179   : > { %v6724_v45 = vpop.f32.mrf.mxu1 }
 0x17a   : > { %v6730_v23 = vpop.f32.mrf.mxu0 }
 0x17b   : > { %v6728_v2 = vpop.f32.mrf.mxu1 }
 0x17c   : > { %v5181_v58 = vpop.f32.mrf.mxu0 }
 0x17d   : > { %v5131_v63 = vpop.f32.mrf.mxu1 }
 0x17e   : > { %v2553_v13 = vadd.f32 %v5131_v63, %v6633_v15  ;;  %v6735_v9 = vpop.f32.mrf.mxu0 }
 0x17f   : > { %v6733_v47 = vpop.f32.mrf.mxu1 }
 0x180   : > { %v6737_v41 = vadd.f32 %v5181_v58, %v2553_v13  ;;  %v5184_v61 = vpop.f32.mrf.mxu0 }
 0x181   : > { %v5134_v40 = vpop.f32.mrf.mxu1 }
 0x182   : > { %v2555_v48 = vadd.f32 %v5134_v40, %v6639_v32  ;;  %v6742_v25 = vpop.f32.mrf.mxu0 }
 0x183   : > { %v6740_v57 = vpop.f32.mrf.mxu1 }
 0x184   : > { %v6744_v20 = vadd.f32 %v5184_v61, %v2555_v48  ;;  %v5187_v4 = vpop.f32.mrf.mxu0 }
 0x185   : > { %v5137_v8 = vpop.f32.mrf.mxu1 }
 0x186   : > { %v2557_v15 = vadd.f32 %v5137_v8, %v6645_v60  ;;  %v6749_v27 = vpop.f32.mrf.mxu0 }
 0x187   : > { %v6747_v19 = vpop.f32.mrf.mxu1 }
 0x188   : > { %v6751_v26 = vadd.f32 %v5187_v4, %v2557_v15  ;;  %v5190_v53 = vpop.f32.mrf.mxu0 }
 0x189   : > { %v5140_v29 = vpop.f32.mrf.mxu1 }
 0x18a   : > { %v2559_v32 = vadd.f32 %v5140_v29, %v6651_v49  ;;  %v6756_v14 = vpop.f32.mrf.mxu0 }
 0x18b   : > { %v6754_v3 = vpop.f32.mrf.mxu1 }
 0x18c   : > { %v6758_v42 = vadd.f32 %v5190_v53, %v2559_v32  ;;  %v5193_v10 = vpop.f32.mrf.mxu0 }
 0x18d   : > { %v5143_v44 = vpop.f32.mrf.mxu1 }
 0x18e   : > { %v2561_v60 = vadd.f32 %v5143_v44, %v6657_v12  ;;  %v6763_v58 = vpop.f32.mrf.mxu0 }
 0x18f   : > { %v6761_v63 = vpop.f32.mrf.mxu1 }
 0x190   : > { %v6765_v13 = vadd.f32 %v5193_v10, %v2561_v60  ;;  %v5196_v61 = vpop.f32.mrf.mxu0 }
 0x191   : > { %v5146_v40 = vpop.f32.mrf.mxu1 }
 0x192   : > { %v2563_v49 = vadd.f32 %v5146_v40, %v6663_v36  ;;  %v6770_v8 = vpop.f32.mrf.mxu0 }
 0x193   : > { %v6768_v48 = vpop.f32.mrf.mxu1 }
 0x194   : > { %v6772_v4 = vadd.f32 %v5196_v61, %v2563_v49  ;;  %v5199_v29 = vpop.f32.mrf.mxu0 }
 0x195   : > { %v5149_v15 = vpop.f32.mrf.mxu1 }
 0x196   : > { %v2565_v12 = vadd.f32 %v5149_v15, %v6669_v50  ;;  %v6777_v32 = vpop.f32.mrf.mxu0 }
 0x197   : > { %v6775_v53 = vpop.f32.mrf.mxu1 }
 0x198   : > { %v6779_v44 = vadd.f32 %v5199_v29, %v2565_v12  ;;  %v5202_v60 = vpop.f32.mrf.mxu0 }
 0x199   : > { %v5152_v10 = vpop.f32.mrf.mxu1 }
 0x19a   : > { %v2567_v36 = vadd.f32 %v5152_v10, %v6675_v35  ;;  %v6784_v30 = vpop.f32.mrf.mxu0 }
 0x19b   : > { %v6782_v40 = vpop.f32.mrf.mxu1  ;;  %7150 = vst [vmem:[#allocation8_spill] sm:$0xff] %v6784_v30 }
 0x19c   : > { %v6786_v61 = vadd.f32 %v5202_v60, %v2567_v36  ;;  %v5205_v37 = vpop.f32.mrf.mxu0 }
 0x19d   : > { %v5155_v49 = vpop.f32.mrf.mxu1 }
 0x19e   : > { %7151 = vst [vmem:[#allocation9_spill] sm:$0xff] %v6786_v61  ;;  %v2569_v50 = vadd.f32 %v5155_v49, %v6681_v55  ;;  %v6791_v11 = vpop.f32.mrf.mxu0 }
 0x19f   : > { %v6789_v15 = vpop.f32.mrf.mxu1 }
 0x1a0   : > { %v6793_v29 = vadd.f32 %v5205_v37, %v2569_v50  ;;  %v5208_v62 = vpop.f32.mrf.mxu0 }
 0x1a1   : > { %v5158_v12 = vpop.f32.mrf.mxu1 }
 0x1a2   : > { %7152 = vst [vmem:[#allocation10_spill] sm:$0xff] %v6793_v29  ;;  %v2571_v35 = vadd.f32 %v5158_v12, %v6687_v24  ;;  %v6798_v59 = vpop.f32.mrf.mxu0 }
 0x1a3   : > { %v6796_v10 = vpop.f32.mrf.mxu1  ;;  %7154 = vst [vmem:[#allocation12_spill] sm:$0xff] %v6798_v59 }
 0x1a4   : > { %7153 = vst [vmem:[#allocation11_spill] sm:$0xff] %v6796_v10  ;;  %v6800_v60 = vadd.f32 %v5208_v62, %v2571_v35  ;;  %v5211_v61 = vpop.f32.mrf.mxu0 }
 0x1a5   : > { %v5161_v36 = vpop.f32.mrf.mxu1 }
 0x1a6   : > { %7155 = vst [vmem:[#allocation13_spill] sm:$0xff] %v6800_v60  ;;  %v2573_v55 = vadd.f32 %v5161_v36, %v6693_v18  ;;  %v6805_v30 = vpop.f32.mrf.mxu0 }
 0x1a7   : > { %v6803_v49 = vpop.f32.mrf.mxu1 }
 0x1a8   : > { %v6807_v37 = vadd.f32 %v5211_v61, %v2573_v55  ;;  %v5214_v29 = vpop.f32.mrf.mxu0  ;;  %v2549_v61 = vadd.f32 %v6714_v56, %v6621_v6  ;;  %v2550_v6 = vadd.f32 %v6728_v2, %v6630_v1 }
 0x1a9   : > { %v5164_v50 = vpop.f32.mrf.mxu1 }
 0x1aa   : > { %v2575_v24 = vadd.f32 %v5164_v50, %v6699_v39  ;;  %v6812_v10 = vpop.f32.mrf.mxu0 }
 0x1ab   : > { %v6810_v12 = vpop.f32.mrf.mxu1  ;;  %7156 = vst [vmem:[#allocation14_spill] sm:$0xff] %v6812_v10 }
 0x1ac   : > { %v6814_v62 = vadd.f32 %v5214_v29, %v2575_v24  ;;  %v5217_v60 = vpop.f32.mrf.mxu0  ;;  %v2548_v29 = vadd.f32 %v6720_v22, %v6624_v51 }
 0x1ad   : > { %v5167_v35 = vpop.f32.mrf.mxu1 }
 0x1ae   : > { %7157 = vst [vmem:[#allocation15_spill] sm:$0xff] %v6814_v62  ;;  %v2577_v18 = vadd.f32 %v5167_v35, %v6705_v0  ;;  %v6819_v59 = vpop.f32.mrf.mxu0  ;;  %v2940_v35 = vadd.f32 %v6716_v16, %v2549_v61  ;;  %v2939_v51 = vadd.f32 %v6722_v46, %v2548_v29 }
 0x1af   : > { %v6817_v36 = vpop.f32.mrf.mxu1  ;;  %7158 = vst [vmem:[#allocation16_spill] sm:$0xff] %v6819_v59  ;;  %v2551_v59 = vadd.f32 %v6724_v45, %v6627_v38  ;;  %v2941_v38 = vadd.f32 %v6730_v23, %v2550_v6  ;;  %v2552_v45 = vadd.f32 %v6733_v47, %v6636_v54  ;;  %v2554_v47 = vadd.f32 %v6740_v57, %v6642_v34 }
 0x1b0   : > { %v6823_v55 = vadd.f32 %v5217_v60, %v2577_v18  ;;  %v5220_v50 = vpop.f32.mrf.mxu0 }
 0x1b1   : > { %v5170_v39 = vpop.f32.mrf.mxu1 }
 0x1b2   : > { %v2579_v24 = vadd.f32 %v5170_v39, %v6711_v21  ;;  %v6830_v0 = vpop.f32.mrf.mxu0  ;;  %v6840_v39 = vstv %s3751_s3 }
 0x1b3   : > { %v6828_v62 = vpop.f32.mrf.mxu1  ;;  %7159 = vst [vmem:[#allocation17_spill] sm:$0xff] %v6830_v0  ;;  %v2942_v0 = vadd.f32 %v6726_v5, %v2551_v59 }
 0x1b4   : > { %v6835_v10 = vadd.f32 %v5220_v50, %v2579_v24  ;;  %v5275_v60 = vpop.f32.mrf.mxu0 }
 0x1b5   : > { %v5225_v56 = vpop.f32.mrf.mxu1 }
 0x1b6   : > { %7160 = vst [vmem:[#allocation18_spill] sm:$0xff] %v6835_v10  ;;  %v3330_v22 = vadd.f32 %v5225_v56, %v2940_v35  ;;  %v3560_v18 = vpop.f32.mrf.mxu0 }
 0x1b7   : > { %v3170_v21 = vpop.f32.mrf.mxu1 }
 0x1b8   : > { %v3720_v16 = vadd.f32 %v5275_v60, %v3330_v22  ;;  %v3329_v61 = vadd.f32 %v3170_v21, %v2939_v51  ;;  %v5278_v1 = vpop.f32.mrf.mxu0  ;;  %v2943_v60 = vadd.f32 %v6735_v9, %v2552_v45  ;;  %v2556_v9 = vadd.f32 %v6747_v19, %v6648_v52 }
 0x1b9   : > { %v5228_v50 = vpop.f32.mrf.mxu1 }
 0x1ba   : > { %v3719_v2 = vadd.f32 %v3560_v18, %v3329_v61  ;;  %v3332_v24 = vadd.f32 %v5228_v50, %v2942_v0  ;;  %vm3753_vm2 = vcmp.ge.f32.partialorder %v3720_v16, 0.0  ;;  %v3786_v46 = vmul.f32 %v6840_v39, %v3720_v16  ;;  %v3570_v35 = vpop.f32.mrf.mxu0 }
 0x1bb   : > { %v3180_v29 = vpop.f32.mrf.mxu1  ;;  %v2947_v19 = vadd.f32 %v6749_v27, %v2556_v9 }
 0x1bc   : > { %v3785_v56 = vmul.f32 %v6840_v39, %v3719_v2  ;;  %v3722_v10 = vadd.f32 %v5278_v1, %v3332_v24  ;;  %v3331_v59 = vadd.f32 %v3180_v29, %v2941_v38  ;;  %v3818_v5 = vsel %vm3753_vm2, %v3720_v16, %v3786_v46  ;;  %v5281_v54 = vpop.f32.mrf.mxu0 }
 0x1bd   : > { %v5231_v23 = vpop.f32.mrf.mxu1  ;;  %3883 = vrot.lane.b32.xlu0 %v3818_v5, %s5341_s21  ;;  %vm3752_vm3 = vcmp.ge.f32.partialorder %v3719_v2, 0.0 }
 0x1be   : > { %v3721_v0 = vadd.f32 %v3570_v35, %v3331_v59  ;;  %v3334_v6 = vadd.f32 %v5231_v23, %v6737_v41  ;;  %vm3755_vm4 = vcmp.ge.f32.partialorder %v3722_v10, 0.0  ;;  %v3788_v22 = vmul.f32 %v6840_v39, %v3722_v10  ;;  %v3580_v21 = vpop.f32.mrf.mxu0 }
 0x1bf   : > { %v3190_v51 = vpop.f32.mrf.mxu1  ;;  %v3817_v16 = vsel %vm3752_vm3, %v3719_v2, %v3785_v56  ;;  %v2945_v41 = vadd.f32 %v6742_v25, %v2554_v47 }
 0x1c0   : > { %v3333_v18 = vadd.f32 %v3190_v51, %v2943_v60  ;;  %v3787_v61 = vmul.f32 %v6840_v39, %v3721_v0  ;;  %v3724_v38 = vadd.f32 %v5281_v54, %v3334_v6  ;;  %v3820_v34 = vsel %vm3755_vm4, %v3722_v10, %v3788_v22  ;;  %v5284_v57 = vpop.f32.mrf.mxu0 }
 0x1c1   : > { %v5234_v45 = vpop.f32.mrf.mxu1  ;;  %3881 = vrot.lane.b32.xlu0 %v3817_v16, %s5341_s21  ;;  %3887 = vrot.lane.b32.xlu1 %v3820_v34, %s5341_s21  ;;  %vm3754_vm5 = vcmp.ge.f32.partialorder %v3721_v0, 0.0  ;;  %v2558_v10 = vadd.f32 %v6754_v3, %v6654_v43  ;;  %v2560_v43 = vadd.f32 %v6761_v63, %v6660_v31 }
 0x1c2   : > { %v3336_v50 = vadd.f32 %v5234_v45, %v6744_v20  ;;  %v3723_v1 = vadd.f32 %v3580_v21, %v3333_v18  ;;  %v3590_v52 = vpop.f32.mrf.mxu0  ;;  %v3790_v29 = vmul.f32 %v6840_v39, %v3724_v38  ;;  %v3819_v20 = vsel %vm3754_vm5, %v3721_v0, %v3787_v61 }
 0x1c3   : > { %v3200_v24 = vpop.f32.mrf.mxu1  ;;  %vm3757_vm7 = vcmp.ge.f32.partialorder %v3724_v38, 0.0  ;;  %v2949_v47 = vadd.f32 %v6756_v14, %v2558_v10  ;;  %v2951_v16 = vadd.f32 %v6763_v58, %v2560_v43 }
 0x1c4   : > { %v3789_v2 = vmul.f32 %v6840_v39, %v3723_v1  ;;  %v3335_v46 = vadd.f32 %v3200_v24, %v2945_v41  ;;  %vm3756_vm6 = vcmp.ge.f32.partialorder %v3723_v1, 0.0  ;;  %v3726_v25 = vadd.f32 %v5284_v57, %v3336_v50  ;;  %v5287_v56 = vpop.f32.mrf.mxu0 }
 0x1c5   : > { %v5237_v35 = vpop.f32.mrf.mxu1  ;;  %3885 = vrot.lane.b32.xlu1 %v3819_v20, %s5341_s21  ;;  %v3822_v51 = vsel %vm3757_vm7, %v3724_v38, %v3790_v29  ;;  %v2562_v38 = vadd.f32 %v6768_v48, %v6666_v33  ;;  %v2564_v33 = vadd.f32 %v6775_v53, %v6672_v17 }
 0x1c6   : > { %v3338_v59 = vadd.f32 %v5237_v35, %v6751_v26  ;;  %v3725_v5 = vadd.f32 %v3590_v52, %v3335_v46  ;;  %v3821_v60 = vsel %vm3756_vm6, %v3723_v1, %v3789_v2  ;;  %v3600_v23 = vpop.f32.mrf.mxu0  ;;  %v3792_v26 = vmul.f32 %v6840_v39, %v3726_v25 }
 0x1c7   : > { %v3210_v27 = vpop.f32.mrf.mxu1  ;;  %3889 = vrot.lane.b32.xlu0 %v3821_v60, %s5341_s21  ;;  %vm3759_vm9 = vcmp.ge.f32.partialorder %v3726_v25, 0.0  ;;  %v2953_v2 = vadd.f32 %v6770_v8, %v2562_v38  ;;  %v2566_v60 = vadd.f32 %v6782_v40, %v6678_v7  ;;  %v2568_v7 = vadd.f32 %v6789_v15, %v6684_v28 }
 0x1c8   : > { %v3791_v3 = vmul.f32 %v6840_v39, %v3725_v5  ;;  %v3337_v54 = vadd.f32 %v3210_v27, %v2947_v19  ;;  %vm3758_vm8 = vcmp.ge.f32.partialorder %v3725_v5, 0.0  ;;  %v3728_v0 = vadd.f32 %v5287_v56, %v3338_v59  ;;  %v5290_v22 = vpop.f32.mrf.mxu0 }
 0x1c9   : > { %v5240_v6 = vpop.f32.mrf.mxu1  ;;  %3891 = vrot.lane.b32.xlu1 %v3822_v51, %s5341_s21  ;;  %v3824_v57 = vsel %vm3759_vm9, %v3726_v25, %v3792_v26  ;;  %v2955_v59 = vadd.f32 %v6777_v32, %v2564_v33  ;;  %v7161_v51 = vld [vmem:[#allocation8_spill] sm:$0xff]  ;;  %v2959_v38 = vadd.f32 %v6791_v11, %v2568_v7  ;;  %v7165_v33 = vld [vmem:[#allocation10_spill] sm:$0xff] }
 0x1ca   : > { %v3340_v21 = vadd.f32 %v5240_v6, %v6758_v42  ;;  %v3727_v9 = vadd.f32 %v3600_v23, %v3337_v54  ;;  %v3823_v18 = vsel %vm3758_vm8, %v3725_v5, %v3791_v3  ;;  %v3610_v63 = vpop.f32.mrf.mxu0  ;;  %v3794_v42 = vmul.f32 %v6840_v39, %v3728_v0 }
 0x1cb   : > { %v3220_v31 = vpop.f32.mrf.mxu1  ;;  %3893 = vrot.lane.b32.xlu0 %v3823_v18, %s5341_s21  ;;  %vm3761_vm11 = vcmp.ge.f32.partialorder %v3728_v0, 0.0 }
 0x1cc   : > { %v3793_v14 = vmul.f32 %v6840_v39, %v3727_v9  ;;  %v3339_v61 = vadd.f32 %v3220_v31, %v2949_v47  ;;  %vm3760_vm10 = vcmp.ge.f32.partialorder %v3727_v9, 0.0  ;;  %v3730_v45 = vadd.f32 %v5290_v22, %v3340_v21  ;;  %v5293_v41 = vpop.f32.mrf.mxu0 }
 0x1cd   : > { %v5243_v34 = vpop.f32.mrf.mxu1  ;;  %3895 = vrot.lane.b32.xlu1 %v3824_v57, %s5341_s21  ;;  %v3826_v29 = vsel %vm3761_vm11, %v3728_v0, %v3794_v42  ;;  %v2957_v22 = vadd.f32 %v7161_v51, %v2566_v60  ;;  %v7164_v57 = vld [vmem:[#allocation11_spill] sm:$0xff] }
 0x1ce   : > { %v3342_v50 = vadd.f32 %v5243_v34, %v6765_v13  ;;  %v3729_v1 = vadd.f32 %v3610_v63, %v3339_v61  ;;  %v3825_v24 = vsel %vm3760_vm10, %v3727_v9, %v3793_v14  ;;  %v3620_v52 = vpop.f32.mrf.mxu0  ;;  %v3796_v13 = vmul.f32 %v6840_v39, %v3730_v45  ;;  %v7162_v63 = vld [vmem:[#allocation9_spill] sm:$0xff]  ;;  %v7163_v34 = vld [vmem:[#allocation3_spill] sm:$0xff] }
 0x1cf   : > { %v3230_v58 = vpop.f32.mrf.mxu1  ;;  %3897 = vrot.lane.b32.xlu0 %v3825_v24, %s5341_s21  ;;  %vm3763_vm13 = vcmp.ge.f32.partialorder %v3730_v45, 0.0 }
 0x1d0   : > { %v3795_v48 = vmul.f32 %v6840_v39, %v3729_v1  ;;  %v3341_v19 = vadd.f32 %v3230_v58, %v2951_v16  ;;  %vm3762_vm12 = vcmp.ge.f32.partialorder %v3729_v1, 0.0  ;;  %v3732_v46 = vadd.f32 %v5293_v41, %v3342_v50  ;;  %v5296_v25 = vpop.f32.mrf.mxu0 }
 0x1d1   : > { %v5246_v10 = vpop.f32.mrf.mxu1  ;;  %3899 = vrot.lane.b32.xlu1 %v3826_v29, %s5341_s21  ;;  %v3828_v43 = vsel %vm3763_vm13, %v3730_v45, %v3796_v13  ;;  %v2570_v41 = vadd.f32 %v7164_v57, %v7163_v34 }
 0x1d2   : > { %v3344_v35 = vadd.f32 %v5246_v10, %v6772_v4  ;;  %v3731_v20 = vadd.f32 %v3620_v52, %v3341_v19  ;;  %v3827_v56 = vsel %vm3762_vm12, %v3729_v1, %v3795_v48  ;;  %v3630_v53 = vpop.f32.mrf.mxu0  ;;  %v3798_v4 = vmul.f32 %v6840_v39, %v3732_v46 }
 0x1d3   : > { %v3240_v17 = vpop.f32.mrf.mxu1  ;;  %3901 = vrot.lane.b32.xlu0 %v3827_v56, %s5341_s21  ;;  %vm3765_vm15 = vcmp.ge.f32.partialorder %v3732_v46, 0.0 }
 0x1d4   : > { %v3797_v8 = vmul.f32 %v6840_v39, %v3731_v20  ;;  %v3343_v5 = vadd.f32 %v3240_v17, %v2953_v2  ;;  %vm3764_vm14 = vcmp.ge.f32.partialorder %v3731_v20, 0.0  ;;  %v3734_v27 = vadd.f32 %v5296_v25, %v3344_v35  ;;  %v5299_v3 = vpop.f32.mrf.mxu0  ;;  %v7167_v35 = vld [vmem:[#allocation12_spill] sm:$0xff] }
 0x1d5   : > { %v5249_v23 = vpop.f32.mrf.mxu1  ;;  %3903 = vrot.lane.b32.xlu1 %v3828_v43, %s5341_s21  ;;  %v3830_v18 = vsel %vm3765_vm15, %v3732_v46, %v3798_v4  ;;  %v7166_v46 = vld [vmem:[#allocation4_spill] sm:$0xff] }
 0x1d6   : > { %v3346_v54 = vadd.f32 %v5249_v23, %v6779_v44  ;;  %v3733_v47 = vadd.f32 %v3630_v53, %v3343_v5  ;;  %v3829_v26 = vsel %vm3764_vm14, %v3731_v20, %v3797_v8  ;;  %v3640_v0 = vpop.f32.mrf.mxu0  ;;  %v3800_v44 = vmul.f32 %v6840_v39, %v3734_v27  ;;  %v7168_v5 = vld [vmem:[#allocation13_spill] sm:$0xff] }
 0x1d7   : > { %v3250_v32 = vpop.f32.mrf.mxu1  ;;  %3905 = vrot.lane.b32.xlu0 %v3829_v26, %s5341_s21  ;;  %vm3767_vm1 = vcmp.ge.f32.partialorder %v3734_v27, 0.0  ;;  %v2572_v10 = vadd.f32 %v6803_v49, %v7166_v46  ;;  %v2961_v20 = vadd.f32 %v7167_v35, %v2570_v41  ;;  %v7173_v41 = vld [vmem:[#allocation16_spill] sm:$0xff] }
 0x1d8   : > { %v3799_v40 = vmul.f32 %v6840_v39, %v3733_v47  ;;  %v3345_v6 = vadd.f32 %v3250_v32, %v2955_v59  ;;  %vm3766_vm0 = vcmp.ge.f32.partialorder %v3733_v47, 0.0  ;;  %v3736_v21 = vadd.f32 %v5299_v3, %v3346_v54  ;;  %v5302_v31 = vpop.f32.mrf.mxu0 }
 0x1d9   : > { %v5252_v9 = vpop.f32.mrf.mxu1  ;;  %3907 = vrot.lane.b32.xlu1 %v3830_v18, %s5341_s21  ;;  %v3832_v58 = vsel %vm3767_vm1, %v3734_v27, %v3800_v44  ;;  %v2963_v43 = vadd.f32 %v6805_v30, %v2572_v10 }
 0x1da   : > { %v3348_v16 = vadd.f32 %v5252_v9, %v7162_v63  ;;  %v3735_v14 = vadd.f32 %v3640_v0, %v3345_v6  ;;  %v3831_v61 = vsel %vm3766_vm0, %v3733_v47, %v3799_v40  ;;  %v3650_v15 = vpop.f32.mrf.mxu0  ;;  %v3802_v50 = vmul.f32 %v6840_v39, %v3736_v21  ;;  %v7169_v47 = vld [vmem:[#allocation5_spill] sm:$0xff]  ;;  %v7170_v9 = vld [vmem:[#allocation6_spill] sm:$0xff] }
 0x1db   : > { %v3260_v28 = vpop.f32.mrf.mxu1  ;;  %3909 = vrot.lane.b32.xlu0 %v3831_v61, %s5341_s21  ;;  %vm3769_vm3 = vcmp.ge.f32.partialorder %v3736_v21, 0.0  ;;  %v2574_v26 = vadd.f32 %v6810_v12, %v7169_v47  ;;  %v2576_v12 = vadd.f32 %v6817_v36, %v7170_v9  ;;  %v7171_v63 = vld [vmem:[#allocation14_spill] sm:$0xff] }
 0x1dc   : > { %v3801_v42 = vmul.f32 %v6840_v39, %v3735_v14  ;;  %v3347_v45 = vadd.f32 %v3260_v28, %v2957_v22  ;;  %vm3768_vm2 = vcmp.ge.f32.partialorder %v3735_v14, 0.0  ;;  %v3738_v1 = vadd.f32 %v5302_v31, %v3348_v16  ;;  %v5305_v52 = vpop.f32.mrf.mxu0 }
 0x1dd   : > { %v5255_v24 = vpop.f32.mrf.mxu1  ;;  %3911 = vrot.lane.b32.xlu1 %v3832_v58, %s5341_s21  ;;  %v3834_v59 = vsel %vm3769_vm3, %v3736_v21, %v3802_v50  ;;  %v2965_v16 = vadd.f32 %v7171_v63, %v2574_v26  ;;  %v2967_v50 = vadd.f32 %v7173_v41, %v2576_v12  ;;  %v7174_v58 = vld [vmem:[#allocation7_spill] sm:$0xff] }
 0x1de   : > { %v3350_v48 = vadd.f32 %v5255_v24, %v7165_v33  ;;  %v3737_v19 = vadd.f32 %v3650_v15, %v3347_v45  ;;  %v3833_v2 = vsel %vm3768_vm2, %v3735_v14, %v3801_v42  ;;  %v3660_v13 = vpop.f32.mrf.mxu0  ;;  %v3804_v56 = vmul.f32 %v6840_v39, %v3738_v1 }
 0x1df   : > { %v3270_v11 = vpop.f32.mrf.mxu1  ;;  %3913 = vrot.lane.b32.xlu0 %v3833_v2, %s5341_s21  ;;  %vm3771_vm5 = vcmp.ge.f32.partialorder %v3738_v1, 0.0  ;;  %vm3977_vm2 = vcmask 97312  }
 0x1e0   : > { %v3803_v29 = vmul.f32 %v6840_v39, %v3737_v19  ;;  %v3349_v25 = vadd.f32 %v3270_v11, %v2959_v38  ;;  %vm3770_vm4 = vcmp.ge.f32.partialorder %v3737_v19, 0.0  ;;  %v3740_v17 = vadd.f32 %v5305_v52, %v3350_v48  ;;  %v5308_v8 = vpop.f32.mrf.mxu0  ;;  %v7172_v38 = vld [vmem:[#allocation15_spill] sm:$0xff] }
 0x1e1   : > { %v5258_v53 = vpop.f32.mrf.mxu1  ;;  %3915 = vrot.lane.b32.xlu1 %v3834_v59, %s5341_s21  ;;  %v3836_v40 = vsel %vm3771_vm5, %v3738_v1, %v3804_v56  ;;  %v2578_v52 = vadd.f32 %v6828_v62, %v7174_v58 }
 0x1e2   : > { %v3352_v60 = vadd.f32 %v5258_v53, %v7168_v5  ;;  %v3739_v4 = vadd.f32 %v3660_v13, %v3349_v25  ;;  %v3835_v27 = vsel %vm3770_vm4, %v3737_v19, %v3803_v29  ;;  %v3670_v23 = vpop.f32.mrf.mxu0  ;;  %v3806_v32 = vmul.f32 %v6840_v39, %v3740_v17  ;;  %v7176_v5 = vld [vmem:[#allocation18_spill] sm:$0xff] }
 0x1e3   : > { %v3280_v49 = vpop.f32.mrf.mxu1  ;;  %3917 = vrot.lane.b32.xlu0 %v3835_v27, %s5341_s21  ;;  %vm3773_vm7 = vcmp.ge.f32.partialorder %v3740_v17, 0.0 }
 0x1e4   : > { %v3805_v3 = vmul.f32 %v6840_v39, %v3739_v4  ;;  %v3351_v54 = vadd.f32 %v3280_v49, %v2961_v20  ;;  %vm3772_vm6 = vcmp.ge.f32.partialorder %v3739_v4, 0.0  ;;  %v3742_v0 = vadd.f32 %v5308_v8, %v3352_v60  ;;  %v5311_v6 = vpop.f32.mrf.mxu0  ;;  %v7175_v20 = vld [vmem:[#allocation17_spill] sm:$0xff] }
 0x1e5   : > { %v5261_v7 = vpop.f32.mrf.mxu1  ;;  %3919 = vrot.lane.b32.xlu1 %v3836_v40, %s5341_s21  ;;  %v3838_v28 = vsel %vm3773_vm7, %v3740_v17, %v3806_v32  ;;  %v2969_v56 = vadd.f32 %v7175_v20, %v2578_v52 }
 0x1e6   : > { %v3354_v51 = vadd.f32 %v5261_v7, %v6807_v37  ;;  %v3741_v22 = vadd.f32 %v3670_v23, %v3351_v54  ;;  %v3837_v44 = vsel %vm3772_vm6, %v3739_v4, %v3805_v3  ;;  %v3680_v21 = vpop.f32.mrf.mxu0  ;;  %v3808_v37 = vmul.f32 %v6840_v39, %v3742_v0 }
 0x1e7   : > { %v3290_v30 = vpop.f32.mrf.mxu1  ;;  %3921 = vrot.lane.b32.xlu0 %v3837_v44, %s5341_s21  ;;  %vm3775_vm9 = vcmp.ge.f32.partialorder %v3742_v0, 0.0 }
 0x1e8   : > { %v3807_v18 = vmul.f32 %v6840_v39, %v3741_v22  ;;  %v3353_v31 = vadd.f32 %v3290_v30, %v2963_v43  ;;  %vm3774_vm8 = vcmp.ge.f32.partialorder %v3741_v22, 0.0  ;;  %v3744_v14 = vadd.f32 %v5311_v6, %v3354_v51  ;;  %v5314_v15 = vpop.f32.mrf.mxu0 }
 0x1e9   : > { %v5264_v61 = vpop.f32.mrf.mxu1  ;;  %3923 = vrot.lane.b32.xlu1 %v3838_v28, %s5341_s21  ;;  %v3840_v2 = vsel %vm3775_vm9, %v3742_v0, %v3808_v37 }
 0x1ea   : > { %v3356_v42 = vadd.f32 %v5264_v61, %v7172_v38  ;;  %v3743_v45 = vadd.f32 %v3680_v21, %v3353_v31  ;;  %v3839_v34 = vsel %vm3774_vm8, %v3741_v22, %v3807_v18  ;;  %v3690_v57 = vpop.f32.mrf.mxu0  ;;  %v3810_v33 = vmul.f32 %v6840_v39, %v3744_v14 }
 0x1eb   : > { %v3300_v36 = vpop.f32.mrf.mxu1  ;;  %3925 = vrot.lane.b32.xlu0 %v3839_v34, %s5341_s21  ;;  %vm3777_vm11 = vcmp.ge.f32.partialorder %v3744_v14, 0.0 }
 0x1ec   : > { %v3809_v1 = vmul.f32 %v6840_v39, %v3743_v45  ;;  %v3355_v24 = vadd.f32 %v3300_v36, %v2965_v16  ;;  %vm3776_vm10 = vcmp.ge.f32.partialorder %v3743_v45, 0.0  ;;  %v3746_v48 = vadd.f32 %v5314_v15, %v3356_v42  ;;  %v5317_v11 = vpop.f32.mrf.mxu0 }
 0x1ed   : > { %v5267_v19 = vpop.f32.mrf.mxu1  ;;  %3927 = vrot.lane.b32.xlu1 %v3840_v2, %s5341_s21 }
 0x1ee   : > { %v3358_v13 = vadd.f32 %v5267_v19, %v6823_v55  ;;  %v3745_v46 = vadd.f32 %v3690_v57, %v3355_v24  ;;  %v3841_v10 = vsel %vm3776_vm10, %v3743_v45, %v3809_v1  ;;  %v3700_v25 = vpop.f32.mrf.mxu0  ;;  %v3812_v17 = vmul.f32 %v6840_v39, %v3746_v48 }
 0x1ef   : > { %v3310_v29 = vpop.f32.mrf.mxu1  ;;  %3929 = vrot.lane.b32.xlu0 %v3841_v10, %s5341_s21  ;;  %v3842_v55 = vsel %vm3777_vm11, %v3744_v14, %v3810_v33  ;;  %vm3779_vm13 = vcmp.ge.f32.partialorder %v3746_v48, 0.0 }
 0x1f0   : > { %v3811_v35 = vmul.f32 %v6840_v39, %v3745_v46  ;;  %v3357_v62 = vadd.f32 %v3310_v29, %v2967_v50  ;;  %vm3778_vm12 = vcmp.ge.f32.partialorder %v3745_v46, 0.0  ;;  %v3748_v53 = vadd.f32 %v5317_v11, %v3358_v13  ;;  %v5320_v8 = vpop.f32.mrf.mxu0 }
 0x1f1   : > { %v5270_v59 = vpop.f32.mrf.mxu1  ;;  %3931 = vrot.lane.b32.xlu1 %v3842_v55, %s5341_s21  ;;  %v3844_v26 = vsel %vm3779_vm13, %v3746_v48, %v3812_v17 }
 0x1f2   : > { %v3360_v60 = vadd.f32 %v5270_v59, %v7176_v5  ;;  %v3747_v4 = vadd.f32 %v3700_v25, %v3357_v62  ;;  %v3843_v27 = vsel %vm3778_vm12, %v3745_v46, %v3811_v35  ;;  %v3710_v23 = vpop.f32.mrf.mxu0  ;;  %v3814_v47 = vmul.f32 %v6840_v39, %v3748_v53 }
 0x1f3   : > { %v3320_v49 = vpop.f32.mrf.mxu1  ;;  %3933 = vrot.lane.b32.xlu0 %v3843_v27, %s5341_s21  ;;  %vm3781_vm15 = vcmp.ge.f32.partialorder %v3748_v53, 0.0 }
 0x1f4   : > { %v3813_v43 = vmul.f32 %v6840_v39, %v3747_v4  ;;  %v3359_v3 = vadd.f32 %v3320_v49, %v2969_v56  ;;  %v3750_v54 = vadd.f32 %v5320_v8, %v3360_v60  ;;  %vm3780_vm14 = vcmp.ge.f32.partialorder %v3747_v4, 0.0 }
 0x1f5   : > { %3935 = vrot.lane.b32.xlu1 %v3844_v26, %s5341_s21  ;;  %v3846_v51 = vsel %vm3781_vm15, %v3748_v53, %v3814_v47 }
 0x1f6   : > { %v3816_v32 = vmul.f32 %v6840_v39, %v3750_v54  ;;  %v3749_v0 = vadd.f32 %v3710_v23, %v3359_v3  ;;  %v3845_v7 = vsel %vm3780_vm14, %v3747_v4, %v3813_v43  ;;  %vm3783_vm0 = vcmp.ge.f32.partialorder %v3750_v54, 0.0 }
 0x1f7   : > { %3937 = vrot.lane.b32.xlu0 %v3845_v7, %s5341_s21 }
 0x1f8   : > { %v3815_v40 = vmul.f32 %v6840_v39, %v3749_v0  ;;  %vm3782_vm1 = vcmp.ge.f32.partialorder %v3749_v0, 0.0  ;;  %v3848_v6 = vsel %vm3783_vm0, %v3750_v54, %v3816_v32 }
 0x1f9   : > { %3939 = vrot.lane.b32.xlu1 %v3846_v51, %s5341_s21 }
 0x1fa   : > { %v3847_v22 = vsel %vm3782_vm1, %v3749_v0, %v3815_v40 }
 0x1fb   : > { %3941 = vrot.lane.b32.xlu0 %v3847_v22, %s5341_s21 }
 0x1fd   : > { %3943 = vrot.lane.b32.xlu1 %v3848_v6, %s5341_s21 }
 0x22f   : > { %v3884_v44 = vpop.permute.xlu0 %3883 }
 0x230   : > { %3979 = vst.msk [vmem:[%s5481_s9 + $0x8] sm:$0xff] %vm3977_vm2, %v3884_v44 }
 0x233   : > { %v3882_v39 = vpop.permute.xlu0 %3881  ;;  %v3888_v30 = vpop.permute.xlu1 %3887 }
 0x234   : > { %3978 = vst.msk [vmem:[%s5481_s9] sm:$0xff] %vm3977_vm2, %v3882_v39  ;;  %3981 = vst.msk [vmem:[%s5481_s9 + $0x18] sm:$0xff] %vm3977_vm2, %v3888_v30 }
 0x237   : > { %v3886_v21 = vpop.permute.xlu1 %3885 }
 0x238   : > { %3980 = vst.msk [vmem:[%s5481_s9 + $0x10] sm:$0xff] %vm3977_vm2, %v3886_v21 }
 0x239   : > { %v3890_v9 = vpop.permute.xlu0 %3889 }
 0x23a   : > { %3982 = vst.msk [vmem:[%s5481_s9 + $0x20] sm:$0xff] %vm3977_vm2, %v3890_v9 }
 0x23b   : > { %v3892_v12 = vpop.permute.xlu1 %3891 }
 0x23c   : > { %3983 = vst.msk [vmem:[%s5481_s9 + $0x28] sm:$0xff] %vm3977_vm2, %v3892_v12 }
 0x23d   : > { %v3894_v18 = vpop.permute.xlu0 %3893 }
 0x23e   : > { %3984 = vst.msk [vmem:[%s5481_s9 + $0x30] sm:$0xff] %vm3977_vm2, %v3894_v18 }
 0x23f   : > { %v3896_v31 = vpop.permute.xlu1 %3895 }
 0x240   : > { %3985 = vst.msk [vmem:[%s5481_s9 + $0x38] sm:$0xff] %vm3977_vm2, %v3896_v31 }
 0x241   : > { %v3898_v63 = vpop.permute.xlu0 %3897 }
 0x242   : > { %3986 = vst.msk [vmem:[%s5481_s9 + $0x40] sm:$0xff] %vm3977_vm2, %v3898_v63 }
 0x243   : > { %v3900_v16 = vpop.permute.xlu1 %3899 }
 0x244   : > { %3987 = vst.msk [vmem:[%s5481_s9 + $0x48] sm:$0xff] %vm3977_vm2, %v3900_v16 }
 0x245   : > { %v3902_v37 = vpop.permute.xlu0 %3901 }
 0x246   : > { %3988 = vst.msk [vmem:[%s5481_s9 + $0x50] sm:$0xff] %vm3977_vm2, %v3902_v37 }
 0x247   : > { %v3904_v14 = vpop.permute.xlu1 %3903 }
 0x248   : > { %3989 = vst.msk [vmem:[%s5481_s9 + $0x58] sm:$0xff] %vm3977_vm2, %v3904_v14 }
 0x249   : > { %v3906_v61 = vpop.permute.xlu0 %3905 }
 0x24a   : > { %3990 = vst.msk [vmem:[%s5481_s9 + $0x60] sm:$0xff] %vm3977_vm2, %v3906_v61 }
 0x24b   : > { %v3908_v28 = vpop.permute.xlu1 %3907 }
 0x24c   : > { %3991 = vst.msk [vmem:[%s5481_s9 + $0x68] sm:$0xff] %vm3977_vm2, %v3908_v28 }
 0x24d   : > { %v3910_v15 = vpop.permute.xlu0 %3909 }
 0x24e   : > { %3992 = vst.msk [vmem:[%s5481_s9 + $0x70] sm:$0xff] %vm3977_vm2, %v3910_v15 }
 0x24f   : > { %v3912_v38 = vpop.permute.xlu1 %3911 }
 0x250   : > { %3993 = vst.msk [vmem:[%s5481_s9 + $0x78] sm:$0xff] %vm3977_vm2, %v3912_v38 }
 0x251   : > { %v3914_v42 = vpop.permute.xlu0 %3913 }
 0x252   : > { %3994 = vst.msk [vmem:[%s5481_s9 + $0x80] sm:$0xff] %vm3977_vm2, %v3914_v42 }
 0x253   : > { %v3916_v45 = vpop.permute.xlu1 %3915 }
 0x254   : > { %3995 = vst.msk [vmem:[%s5481_s9 + $0x88] sm:$0xff] %vm3977_vm2, %v3916_v45 }
 0x255   : > { %v3918_v34 = vpop.permute.xlu0 %3917 }
 0x256   : > { %3996 = vst.msk [vmem:[%s5481_s9 + $0x90] sm:$0xff] %vm3977_vm2, %v3918_v34 }
 0x257   : > { %v3920_v36 = vpop.permute.xlu1 %3919 }
 0x258   : > { %3997 = vst.msk [vmem:[%s5481_s9 + $0x98] sm:$0xff] %vm3977_vm2, %v3920_v36 }
 0x259   : > { %v3922_v57 = vpop.permute.xlu0 %3921 }
 0x25a   : > { %3998 = vst.msk [vmem:[%s5481_s9 + $0xa0] sm:$0xff] %vm3977_vm2, %v3922_v57 }
 0x25b   : > { %v3924_v41 = vpop.permute.xlu1 %3923 }
 0x25c   : > { %3999 = vst.msk [vmem:[%s5481_s9 + $0xa8] sm:$0xff] %vm3977_vm2, %v3924_v41 }
 0x25d   : > { %v3926_v50 = vpop.permute.xlu0 %3925 }
 0x25e   : > { %4000 = vst.msk [vmem:[%s5481_s9 + $0xb0] sm:$0xff] %vm3977_vm2, %v3926_v50 }
 0x25f   : > { %v3928_v1 = vpop.permute.xlu1 %3927 }
 0x260   : > { %4001 = vst.msk [vmem:[%s5481_s9 + $0xb8] sm:$0xff] %vm3977_vm2, %v3928_v1 }
 0x261   : > { %v3930_v24 = vpop.permute.xlu0 %3929 }
 0x262   : > { %4002 = vst.msk [vmem:[%s5481_s9 + $0xc0] sm:$0xff] %vm3977_vm2, %v3930_v24 }
 0x263   : > { %v3932_v58 = vpop.permute.xlu1 %3931 }
 0x264   : > { %4003 = vst.msk [vmem:[%s5481_s9 + $0xc8] sm:$0xff] %vm3977_vm2, %v3932_v58 }
 0x265   : > { %v3934_v52 = vpop.permute.xlu0 %3933 }
 0x266   : > { %4004 = vst.msk [vmem:[%s5481_s9 + $0xd0] sm:$0xff] %vm3977_vm2, %v3934_v52 }
 0x267   : > { %v3936_v33 = vpop.permute.xlu1 %3935 }
 0x268   : > { %4005 = vst.msk [vmem:[%s5481_s9 + $0xd8] sm:$0xff] %vm3977_vm2, %v3936_v33 }
 0x269   : > { %v3938_v48 = vpop.permute.xlu0 %3937 }
 0x26a   : > { %4006 = vst.msk [vmem:[%s5481_s9 + $0xe0] sm:$0xff] %vm3977_vm2, %v3938_v48 }
 0x26b   : > { %v3940_v19 = vpop.permute.xlu1 %3939 }
 0x26c   : > { %4007 = vst.msk [vmem:[%s5481_s9 + $0xe8] sm:$0xff] %vm3977_vm2, %v3940_v19 }
 0x26d   : > { %v3942_v2 = vpop.permute.xlu0 %3941 }
 0x26e   : > { %4008 = vst.msk [vmem:[%s5481_s9 + $0xf0] sm:$0xff] %vm3977_vm2, %v3942_v2 }
 0x26f   : > { %v3944_v11 = vpop.permute.xlu1 %3943 }
 0x270   : > { %4009 = vst.msk [vmem:[%s5481_s9 + $0xf8] sm:$0xff] %vm3977_vm2, %v3944_v11 }
 0x271 PF: > { %s15_s17 = sadd.s32 1, %s5339_s17  }
 0x272   : > { %p12_p4 = scmp.ge.s32.totalorder %s15_s17, 4  }
 0x274   :  { %14 = sbr.rel (!%p12_p4) target bundleno = 2 (0x2), region = 76 }

</bundles_post_ra>
